<compile_context>
chip_gen: v7x
topology: tpu7x:2x2x1
jax: 0.10.0
libtpu: 0.0.40
codegen_flags: <defaults>
</compile_context>

<pallas_src>
import functools
import math

import jax
import jax.numpy as jnp
from jax.experimental import pallas as pl
from jax.experimental.pallas import tpu as pltpu

NUM_PARAMS = 5                       # hardcoded to 5 in likelihood_v2 / the tolerance test
NRED = 21                            # 1 logL + 5 grad + 15 upper-tri Hessian reductions
OUT_W = 128                          # packed output slab width (lane-dense store)
_KEPS = 1000.0 * 2.220446049250313e-16
_INV_2PI = float(1.0 / (2.0 * math.pi))


def _round_up(x, m):
    return ((x + m - 1) // m) * m


def _detect_vmem_capacity():
    try:
        info = pltpu.get_tpu_info()
        for name in ("vmem_capacity_bytes", "vmem_bytes", "vmem_size_bytes"):
            v = getattr(info, name, None)
            if v:
                return int(v)
    except Exception:
        pass
    return 64 * 1024 * 1024          # conservative (v7x-sized) fallback


def _tiling_for_backend(B):
    cap = _detect_vmem_capacity()
    if cap >= 100 * 1024 * 1024:     # v5e / v6e: 128 MiB physical VMEM
        max_tb, vmem_limit = 1024, 96 * 1024 * 1024
    else:                            # v7x / unknown: 64 MiB physical VMEM -> leave headroom
        max_tb, vmem_limit = 512, 48 * 1024 * 1024
    # target >= 4 grid blocks so megacore sharding / pipelining has work
    tb = min(max_tb, _round_up(max(1, (B + 3) // 4), 8))
    tb = max(tb, 8)
    return tb, vmem_limit


# -----------------------------------------------------------------------------
# Fused kernel: surrogate PSF model + likelihood_v2 (simflux=False, varfit=0)
# for one block of TB ROIs.
#   bd_ref  : (NRED*128, OUT_W)  block-diagonal +/-1 reduction matrix (constant)
#   xx_ref  : (1, MN)            pixel x coordinates (flattened row-major)
#   yy_ref  : (1, MN)            pixel y coordinates
#   smp_ref : (TB, MN)           sample / image block
#   cur_ref : (TB, 5)            current parameters [x, y, z, I, bg]
#   out_ref : (TB, OUT_W)        packed slab: col0 logL, 1..5 grad, 6..20 triu(Hess)
#   mu_ref  : (TB, MN)           model expectation (needed for the final chi^2)
#   pck_ref : (TB, NRED*128)     VMEM scratch holding the lane-folded products
# -----------------------------------------------------------------------------
def _lm_mle_kernel(bd_ref, xx_ref, yy_ref, smp_ref, cur_ref, out_ref, mu_ref, pck_ref,
                   *, mn_valid):
    f32 = jnp.float32
    smp = smp_ref[...]                               # (TB, MN)
    cur = cur_ref[...]                               # (TB, 5)
    xx = xx_ref[...]                                 # (1, MN)
    yy = yy_ref[...]

    x0 = cur[:, 0:1]
    y0 = cur[:, 1:2]
    z = cur[:, 2:3]
    inten = cur[:, 3:4]
    bg = cur[:, 4:5]

    # ---- fused surrogate PSF model (2D Gaussian; stands in for the pupil-function PSF) ----
    sigma = 1.3 * (1.0 + 0.5 * z * z)                # (TB, 1)
    inv_s2 = 1.0 / (sigma * sigma)                   # (TB, 1) -- tiny, plain divide is fine
    dx = xx - x0                                     # (TB, MN)
    dy = yy - y0
    r2 = dx * dx + dy * dy
    e = r2 * inv_s2
    g = jnp.exp(-0.5 * e)                            # EUP
    psf = g * (inv_s2 * _INV_2PI)
    ipsf = inten * psf
    mu = ipsf + bg
    mu_ref[...] = mu

    a_z = (1.3 * z) / sigma                          # (TB, 1): dsigma/dz / sigma
    j0 = ipsf * dx * inv_s2                          # d mu / d x0
    j1 = ipsf * dy * inv_s2                          # d mu / d y0
    j2 = ipsf * ((e - 2.0) * a_z)                    # d mu / d z
    j3 = psf                                         # d mu / d I
    jac = (j0, j1, j2, j3)                           # d mu / d bg == 1 handled implicitly

    # ---- likelihood_v2 weights ----
    keps = f32(_KEPS)
    mupos = jnp.where(mu > 0, mu, jnp.where(mu < 0, keps, f32(0.0)))
    inv = pl.reciprocal(mupos, approx=True)          # EUP
    inv = inv * (2.0 - mupos * inv)                  # one Newton step -> ~f32 accuracy
    logmu = jnp.log(mupos)                           # EUP
    t = smp * inv
    weight = (smp - mupos) * inv                     # cancellation-safe form of smp/mupos - 1
    dweight = t * inv                                # smp / mupos^2

    mn = smp.shape[-1]
    if mn_valid != mn:
        col = jax.lax.broadcasted_iota(jnp.int32, (1, mn), 1)
        mask = (col < mn_valid).astype(f32)
        weight = weight * mask
        dweight = dweight * mask
        logl_term = (smp * logmu - mupos) * mask
    else:
        logl_term = smp * logmu - mupos

    # ---- 21 unique reduction integrands ----
    cols = [logl_term]                               # logL
    for p in range(4):
        cols.append(weight * jac[p])                 # grad 0..3
    cols.append(weight)                              # grad 4 (jac_bg == 1)
    wj = [dweight * jac[i] for i in range(4)]
    for i in range(4):
        for j in range(i, 4):
            cols.append(wj[i] * jac[j])              # Hess(i, j), i <= j < 4
        cols.append(wj[i])                           # Hess(i, 4)
    cols.append(dweight)                             # Hess(4, 4)
    # (the -1 of the Hessian is baked into bd_ref columns 6..20)

    # ---- lane-fold each product to 128 lanes (VALU), pack, then one MXU matmul ----
    def lane_fold(x):
        acc = x[:, 0:128]
        for c in range(1, mn // 128):
            acc = acc + x[:, c * 128:(c + 1) * 128]
        return acc

    for k, c in enumerate(cols):
        pck_ref[:, k * 128:(k + 1) * 128] = lane_fold(c)

    out_ref[...] = jnp.dot(pck_ref[...], bd_ref[...], preferred_element_type=jnp.float32)


def likelihood_fused(ones_bd, xx, yy, smp_flat, cur, *, tb, mn_valid, vmem_limit):
    """smp_flat: [B_pad, MN], cur: [B_pad, 5] -> packed slab [B_pad, OUT_W], mu [B_pad, MN]."""
    B_pad, MN = smp_flat.shape
    P = cur.shape[1]
    kernel = functools.partial(_lm_mle_kernel, mn_valid=mn_valid)

    out_slab, mu = pl.pallas_call(
        kernel,
        out_shape=(
            jax.ShapeDtypeStruct((B_pad, OUT_W), jnp.float32),
            jax.ShapeDtypeStruct((B_pad, MN), jnp.float32),
        ),
        grid_spec=pltpu.PrefetchScalarGridSpec(
            num_scalar_prefetch=0,
            grid=(B_pad // tb,),
            in_specs=[
                pl.BlockSpec((NRED * 128, OUT_W), lambda b: (0, 0)),   # constant, DMA'd once
                pl.BlockSpec((1, MN), lambda b: (0, 0)),
                pl.BlockSpec((1, MN), lambda b: (0, 0)),
                pl.BlockSpec((tb, MN), lambda b: (b, 0)),
                pl.BlockSpec((tb, P), lambda b: (b, 0)),
            ],
            out_specs=[
                pl.BlockSpec((tb, OUT_W), lambda b: (b, 0)),
                pl.BlockSpec((tb, MN), lambda b: (b, 0)),
            ],
            scratch_shapes=[pltpu.VMEM((tb, NRED * 128), jnp.float32)],
        ),
        compiler_params=pltpu.CompilerParams(
            dimension_semantics=("parallel",),       # shards ROI blocks across TCs
            vmem_limit_bytes=vmem_limit,
        ),
    )(ones_bd, xx, yy, smp_flat, cur)
    return out_slab, mu


# -----------------------------------------------------------------------------
# JAX glue: unpack slab, MLE_instead_lmupdate step, LM_MLE.forward loop
# -----------------------------------------------------------------------------
_TRIU_I = [i for i in range(NUM_PARAMS) for j in range(i, NUM_PARAMS)]
_TRIU_J = [j for i in range(NUM_PARAMS) for j in range(i, NUM_PARAMS)]


def _unpack_slab(out_slab):
    P = NUM_PARAMS
    logl = out_slab[:, 0]
    grad = out_slab[:, 1:1 + P]
    tri = out_slab[:, 1 + P:1 + P + len(_TRIU_I)]               # (B, 15), already -sum(...)
    Bn = out_slab.shape[0]
    iu = jnp.array(_TRIU_I, dtype=jnp.int32)
    ju = jnp.array(_TRIU_J, dtype=jnp.int32)
    hess = jnp.zeros((Bn, P, P), out_slab.dtype)
    hess = hess.at[:, iu, ju].set(tri).at[:, ju, iu].set(tri)   # mirror lower triangle
    return logl, grad, hess


def _mle_step(cur, grad, hess, lambda_, param_range_min_max):
    diag = jnp.diagonal(hess, axis1=-2, axis2=-1)               # [B, P]
    eye = jnp.eye(hess.shape[-1], dtype=hess.dtype)
    Bmat = hess + lambda_ * diag[:, :, None] * eye[None]
    dtheta = jnp.linalg.solve(-Bmat, grad[..., None])[..., 0]   # batched 5x5 solve
    dtheta = jnp.where(jnp.isnan(dtheta), -0.1 * cur, dtheta)
    cur = cur + dtheta
    cur = jnp.maximum(cur, param_range_min_max[None, :, 0])
    cur = jnp.minimum(cur, param_range_min_max[None, :, 1])
    return cur


def lm_mle_forward(smp, thetatry, param_range_min_max, iterations, lambda_, tol):
    B, M, N = smp.shape
    P = thetatry.shape[1]
    MN0 = M * N
    MN = _round_up(MN0, 128)

    TB, vmem_limit = _tiling_for_backend(B)
    B_pad = _round_up(B, TB)

    # pixel coordinate grids, flattened row-major to match smp.reshape(B, M*N)
    yy, xx = jnp.meshgrid(
        jnp.arange(M, dtype=jnp.float32), jnp.arange(N, dtype=jnp.float32), indexing="ij"
    )
    xx = xx.reshape(1, MN0)
    yy = yy.reshape(1, MN0)
    smp_flat = smp.reshape(B, MN0).astype(jnp.float32)
    if MN != MN0:
        # pad pixels take pixel (0,0)'s coordinates (mu stays finite); their
        # likelihood contribution is masked out inside the kernel.
        xx = jnp.pad(xx, ((0, 0), (0, MN - MN0)))
        yy = jnp.pad(yy, ((0, 0), (0, MN - MN0)))
        smp_flat = jnp.pad(smp_flat, ((0, 0), (0, MN - MN0)))

    # pad the batch ONCE, outside the LM loop
    cur = thetatry.astype(jnp.float32) * 1.0
    if B_pad != B:
        smp_flat = jnp.pad(smp_flat, ((0, B_pad - B), (0, 0)))
        cur = jnp.pad(cur, ((0, B_pad - B), (0, 0)), constant_values=1.0)

    # block-diagonal reduction matrix: col k sums lane chunk k; Hessian cols carry -1
    rows = jnp.arange(NRED * 128, dtype=jnp.int32)[:, None] // 128     # (NRED*128, 1)
    colidx = jnp.arange(OUT_W, dtype=jnp.int32)[None, :]               # (1, OUT_W)
    sign = jnp.where(colidx >= 1 + P, -1.0, 1.0)
    ones_bd = jnp.where(rows == colidx, sign, 0.0).astype(jnp.float32)

    mu_flat = jnp.zeros((B_pad, MN), jnp.float32)
    traces = jnp.zeros((iterations + 1, B_pad, P), jnp.float32).at[0].set(cur)
    tol_arr = jnp.full((B_pad, P), tol, jnp.float32)
    good = jnp.ones((B_pad,), dtype=bool)
    delta = jnp.ones((B_pad, P), jnp.float32)
    bool_arr = jnp.ones((B_pad, P), dtype=bool)

    for i in range(iterations):
        out_slab, mu_new = likelihood_fused(
            ones_bd, xx, yy, smp_flat, cur, tb=TB, mn_valid=MN0, vmem_limit=vmem_limit
        )
        mu_flat = jnp.where(good[:, None], mu_new, mu_flat)

        _logl, grad, hess = _unpack_slab(out_slab)
        cur_new = _mle_step(cur, grad, hess, lambda_, param_range_min_max)
        cur = jnp.where(good[:, None], cur_new, cur)

        traces = traces.at[i + 1].set(jnp.where(good[:, None], cur, 0.0))
        # faithful to the torch indexing (i-1 wraps to the last, all-zero row at i=0)
        delta = jnp.where(good[:, None], jnp.abs(traces[i - 1] - traces[i]), delta)
        bool_arr = jnp.where(good[:, None], delta < tol_arr, bool_arr)
        test = jnp.sum(bool_arr.astype(jnp.int32), axis=1)
        good = test != NUM_PARAMS

    mu = mu_flat[:B, :MN0].reshape(B, M, N)
    return cur[:B], traces[:, :B], (smp - mu) ** 2 / mu


# -----------------------------------------------------------------------------
# Surrogate model in plain JAX (used only to synthesize demo data in __main__).
# -----------------------------------------------------------------------------
def surrogate_mu(theta, M, N):
    yy, xx = jnp.meshgrid(
        jnp.arange(M, dtype=jnp.float32), jnp.arange(N, dtype=jnp.float32), indexing="ij"
    )
    xx = xx.reshape(1, -1)
    yy = yy.reshape(1, -1)
    x0, y0, z = theta[:, 0:1], theta[:, 1:2], theta[:, 2:3]
    inten, bg = theta[:, 3:4], theta[:, 4:5]
    sigma = 1.3 * (1.0 + 0.5 * z * z)
    inv_s2 = 1.0 / (sigma * sigma)
    dx = xx - x0
    dy = yy - y0
    psf = jnp.exp(-0.5 * (dx * dx + dy * dy) * inv_s2) * inv_s2 * _INV_2PI
    return (inten * psf + bg).reshape(-1, M, N)


# -----------------------------------------------------------------------------
if __name__ == "__main__":
    B, M, N = 4, 16, 16
    ITERATIONS = 6
    LAMBDA = 1e-2
    TOL = 1e-5

    key = jax.random.PRNGKey(0)
    k1, k2, k3 = jax.random.split(key, 3)

    theta_true = jnp.stack(
        [
            7.5 + jax.random.uniform(k1, (B,), minval=-1.0, maxval=1.0),
            7.5 + jax.random.uniform(k2, (B,), minval=-1.0, maxval=1.0),
            jnp.full((B,), 0.1),
            jnp.full((B,), 2000.0),
            jnp.full((B,), 5.0),
        ],
        axis=1,
    ).astype(jnp.float32)

    mu_true = surrogate_mu(theta_true, M, N)
    noise = jax.random.uniform(k3, mu_true.shape, minval=-0.5, maxval=0.5)
    smp = jnp.maximum(mu_true + jnp.sqrt(mu_true) * noise, 1e-3).astype(jnp.float32)

    theta0 = (theta_true + jnp.array([0.5, -0.5, 0.05, 150.0, 1.0], jnp.float32)[None]).astype(
        jnp.float32
    )
    param_range_min_max = jnp.array(
        [
            [1.0, float(M - 2)],
            [1.0, float(N - 2)],
            [-1.0, 1.0],
            [1.0, 1.0e6],
            [1.0e-2, 1.0e3],
        ],
        jnp.float32,
    )

    run = jax.jit(
        functools.partial(lm_mle_forward, iterations=ITERATIONS, lambda_=LAMBDA, tol=TOL)
    )
    cur, traces, chi2 = run(smp, theta0, param_range_min_max)
    jax.block_until_ready((cur, traces, chi2))
    print("KERNEL_OK")
</pallas_src>

<mosaic_0001>
module attributes {stable_mosaic.version = 11 : i64} {
  func.func @_lm_mle_kernel(%arg0: i32, %arg1: memref<2688x128xf32, #tpu.memory_space<vmem>>, %arg2: memref<1x256xf32, #tpu.memory_space<vmem>>, %arg3: memref<1x256xf32, #tpu.memory_space<vmem>>, %arg4: memref<8x256xf32, #tpu.memory_space<vmem>>, %arg5: memref<8x5xf32, #tpu.memory_space<vmem>>, %arg6: memref<8x128xf32, #tpu.memory_space<vmem>>, %arg7: memref<8x256xf32, #tpu.memory_space<vmem>>, %arg8: memref<8x2688xf32, #tpu.memory_space<vmem>>) attributes {dimension_semantics = [#tpu.dimension_semantics<parallel>], iteration_bounds = array<i64: 1>, scalar_prefetch = 0 : i64, scratch_operands = 1 : i64, tpu.core_type = #tpu.core_type<tc>, window_params = [{pipeline_mode = #tpu.pipeline_mode<synchronous>, transform_indices = @transform_0, window_bounds = array<i64: 2688, 128>}, {pipeline_mode = #tpu.pipeline_mode<synchronous>, transform_indices = @transform_1, window_bounds = array<i64: 1, 256>}, {pipeline_mode = #tpu.pipeline_mode<synchronous>, transform_indices = @transform_2, window_bounds = array<i64: 1, 256>}, {transform_indices = @transform_3, window_bounds = array<i64: 8, 256>}, {transform_indices = @transform_4, window_bounds = array<i64: 8, 5>}, {transform_indices = @transform_5, window_bounds = array<i64: 8, 128>}, {transform_indices = @transform_6, window_bounds = array<i64: 8, 256>}]} {
    %c0 = arith.constant 0 : index
    %c0_0 = arith.constant 0 : index
    %0 = vector.load %arg4[%c0, %c0_0] : memref<8x256xf32, #tpu.memory_space<vmem>>, vector<8x256xf32>
    %c0_1 = arith.constant 0 : index
    %c0_2 = arith.constant 0 : index
    %1 = vector.load %arg5[%c0_1, %c0_2] : memref<8x5xf32, #tpu.memory_space<vmem>>, vector<8x5xf32>
    %c0_3 = arith.constant 0 : index
    %c0_4 = arith.constant 0 : index
    %2 = vector.load %arg2[%c0_3, %c0_4] : memref<1x256xf32, #tpu.memory_space<vmem>>, vector<1x256xf32>
    %c0_5 = arith.constant 0 : index
    %c0_6 = arith.constant 0 : index
    %3 = vector.load %arg3[%c0_5, %c0_6] : memref<1x256xf32, #tpu.memory_space<vmem>>, vector<1x256xf32>
    %4 = vector.extract_strided_slice %1 {offsets = [0, 0], sizes = [8, 1], strides = [1, 1]} : vector<8x5xf32> to vector<8x1xf32>
    %5 = vector.extract_strided_slice %1 {offsets = [0, 1], sizes = [8, 1], strides = [1, 1]} : vector<8x5xf32> to vector<8x1xf32>
    %6 = vector.extract_strided_slice %1 {offsets = [0, 2], sizes = [8, 1], strides = [1, 1]} : vector<8x5xf32> to vector<8x1xf32>
    %7 = vector.extract_strided_slice %1 {offsets = [0, 3], sizes = [8, 1], strides = [1, 1]} : vector<8x5xf32> to vector<8x1xf32>
    %8 = vector.extract_strided_slice %1 {offsets = [0, 4], sizes = [8, 1], strides = [1, 1]} : vector<8x5xf32> to vector<8x1xf32>
    %cst = arith.constant 5.000000e-01 : f32
    %9 = vector.broadcast %cst : f32 to vector<8x1xf32>
    %10 = arith.mulf %9, %6 : vector<8x1xf32>
    %11 = arith.mulf %10, %6 : vector<8x1xf32>
    %cst_7 = arith.constant 1.000000e+00 : f32
    %12 = vector.broadcast %cst_7 : f32 to vector<8x1xf32>
    %13 = arith.addf %12, %11 : vector<8x1xf32>
    %cst_8 = arith.constant 1.300000e+00 : f32
    %14 = vector.broadcast %cst_8 : f32 to vector<8x1xf32>
    %15 = arith.mulf %14, %13 : vector<8x1xf32>
    %16 = arith.mulf %15, %15 : vector<8x1xf32>
    %cst_9 = arith.constant 1.000000e+00 : f32
    %17 = vector.broadcast %cst_9 : f32 to vector<8x1xf32>
    %18 = arith.divf %17, %16 : vector<8x1xf32>
    %19 = vector.broadcast %2 : vector<1x256xf32> to vector<8x256xf32>
    %20 = vector.broadcast %4 : vector<8x1xf32> to vector<8x256xf32>
    %21 = arith.subf %19, %20 : vector<8x256xf32>
    %22 = vector.broadcast %3 : vector<1x256xf32> to vector<8x256xf32>
    %23 = vector.broadcast %5 : vector<8x1xf32> to vector<8x256xf32>
    %24 = arith.subf %22, %23 : vector<8x256xf32>
    %25 = arith.mulf %21, %21 : vector<8x256xf32>
    %26 = arith.mulf %24, %24 : vector<8x256xf32>
    %27 = arith.addf %25, %26 : vector<8x256xf32>
    %28 = vector.broadcast %18 : vector<8x1xf32> to vector<8x256xf32>
    %29 = arith.mulf %27, %28 : vector<8x256xf32>
    %cst_10 = arith.constant -5.000000e-01 : f32
    %30 = vector.broadcast %cst_10 : f32 to vector<8x256xf32>
    %31 = arith.mulf %30, %29 : vector<8x256xf32>
    %32 = math.exp %31 : vector<8x256xf32>
    %cst_11 = arith.constant 0.159154937 : f32
    %33 = vector.broadcast %cst_11 : f32 to vector<8x1xf32>
    %34 = arith.mulf %18, %33 : vector<8x1xf32>
    %35 = vector.broadcast %34 : vector<8x1xf32> to vector<8x256xf32>
    %36 = arith.mulf %32, %35 : vector<8x256xf32>
    %37 = vector.broadcast %7 : vector<8x1xf32> to vector<8x256xf32>
    %38 = arith.mulf %37, %36 : vector<8x256xf32>
    %39 = vector.broadcast %8 : vector<8x1xf32> to vector<8x256xf32>
    %40 = arith.addf %38, %39 : vector<8x256xf32>
    %c0_12 = arith.constant 0 : index
    %c0_13 = arith.constant 0 : index
    %41 = vector.load %arg7[%c0_12, %c0_13] : memref<8x256xf32, #tpu.memory_space<vmem>>, vector<8x256xf32>
    tpu.vector_store %arg7[%c0_12, %c0_13], %40 {strides = array<i32>} : memref<8x256xf32, #tpu.memory_space<vmem>>, vector<8x256xf32>,
    %cst_14 = arith.constant 1.300000e+00 : f32
    %42 = vector.broadcast %cst_14 : f32 to vector<8x1xf32>
    %43 = arith.mulf %42, %6 : vector<8x1xf32>
    %44 = arith.divf %43, %15 : vector<8x1xf32>
    %45 = arith.mulf %38, %21 : vector<8x256xf32>
    %46 = vector.broadcast %18 : vector<8x1xf32> to vector<8x256xf32>
    %47 = arith.mulf %45, %46 : vector<8x256xf32>
    %48 = arith.mulf %38, %24 : vector<8x256xf32>
    %49 = vector.broadcast %18 : vector<8x1xf32> to vector<8x256xf32>
    %50 = arith.mulf %48, %49 : vector<8x256xf32>
    %cst_15 = arith.constant 2.000000e+00 : f32
    %51 = vector.broadcast %cst_15 : f32 to vector<8x256xf32>
    %52 = arith.subf %29, %51 : vector<8x256xf32>
    %53 = vector.broadcast %44 : vector<8x1xf32> to vector<8x256xf32>
    %54 = arith.mulf %52, %53 : vector<8x256xf32>
    %55 = arith.mulf %38, %54 : vector<8x256xf32>
    %cst_16 = arith.constant 0.000000e+00 : f32
    %56 = vector.broadcast %cst_16 : f32 to vector<8x256xf32>
    %57 = arith.cmpf ogt, %40, %56 : vector<8x256xf32>
    %cst_17 = arith.constant 0.000000e+00 : f32
    %58 = vector.broadcast %cst_17 : f32 to vector<8x256xf32>
    %59 = arith.cmpf olt, %40, %58 : vector<8x256xf32>
    %cst_18 = arith.constant 2.22044605E-13 : f32
    %cst_19 = arith.constant 0.000000e+00 : f32
    %60 = vector.broadcast %cst_18 : f32 to vector<8x256xf32>
    %61 = vector.broadcast %cst_19 : f32 to vector<8x256xf32>
    %62 = arith.select %59, %60, %61 : vector<8x256xi1>, vector<8x256xf32>
    %63 = arith.select %57, %40, %62 : vector<8x256xi1>, vector<8x256xf32>
    %64 = tpu.reciprocal %63 {approx = true} : vector<8x256xf32> -> vector<8x256xf32>
    %65 = arith.mulf %63, %64 : vector<8x256xf32>
    %cst_20 = arith.constant 2.000000e+00 : f32
    %66 = vector.broadcast %cst_20 : f32 to vector<8x256xf32>
    %67 = arith.subf %66, %65 : vector<8x256xf32>
    %68 = arith.mulf %64, %67 : vector<8x256xf32>
    %69 = math.log %63 : vector<8x256xf32>
    %70 = arith.mulf %0, %68 : vector<8x256xf32>
    %71 = arith.subf %0, %63 : vector<8x256xf32>
    %72 = arith.mulf %71, %68 : vector<8x256xf32>
    %73 = arith.mulf %70, %68 : vector<8x256xf32>
    %74 = arith.mulf %0, %69 : vector<8x256xf32>
    %75 = arith.subf %74, %63 : vector<8x256xf32>
    %76 = arith.mulf %72, %47 : vector<8x256xf32>
    %77 = arith.mulf %72, %50 : vector<8x256xf32>
    %78 = arith.mulf %72, %55 : vector<8x256xf32>
    %79 = arith.mulf %72, %36 : vector<8x256xf32>
    %80 = arith.mulf %73, %47 : vector<8x256xf32>
    %81 = arith.mulf %73, %50 : vector<8x256xf32>
    %82 = arith.mulf %73, %55 : vector<8x256xf32>
    %83 = arith.mulf %73, %36 : vector<8x256xf32>
    %84 = arith.mulf %80, %47 : vector<8x256xf32>
    %85 = arith.mulf %80, %50 : vector<8x256xf32>
    %86 = arith.mulf %80, %55 : vector<8x256xf32>
    %87 = arith.mulf %80, %36 : vector<8x256xf32>
    %88 = arith.mulf %81, %50 : vector<8x256xf32>
    %89 = arith.mulf %81, %55 : vector<8x256xf32>
    %90 = arith.mulf %81, %36 : vector<8x256xf32>
    %91 = arith.mulf %82, %55 : vector<8x256xf32>
    %92 = arith.mulf %82, %36 : vector<8x256xf32>
    %93 = arith.mulf %83, %36 : vector<8x256xf32>
    %94 = vector.extract_strided_slice %75 {offsets = [0, 0], sizes = [8, 128], strides = [1, 1]} : vector<8x256xf32> to vector<8x128xf32>
    %95 = vector.extract_strided_slice %75 {offsets = [0, 128], sizes = [8, 128], strides = [1, 1]} : vector<8x256xf32> to vector<8x128xf32>
    %96 = arith.addf %94, %95 : vector<8x128xf32>
    %c0_21 = arith.constant 0 : index
    %c0_22 = arith.constant 0 : index
    %97 = vector.load %arg8[%c0_21, %c0_22] : memref<8x2688xf32, #tpu.memory_space<vmem>>, vector<8x128xf32>
    tpu.vector_store %arg8[%c0_21, %c0_22], %96 {strides = array<i32>} : memref<8x2688xf32, #tpu.memory_space<vmem>>, vector<8x128xf32>,
    %98 = vector.extract_strided_slice %76 {offsets = [0, 0], sizes = [8, 128], strides = [1, 1]} : vector<8x256xf32> to vector<8x128xf32>
    %99 = vector.extract_strided_slice %76 {offsets = [0, 128], sizes = [8, 128], strides = [1, 1]} : vector<8x256xf32> to vector<8x128xf32>
    %100 = arith.addf %98, %99 : vector<8x128xf32>
    %c0_23 = arith.constant 0 : index
    %c128 = arith.constant 128 : index
    %101 = vector.load %arg8[%c0_23, %c128] : memref<8x2688xf32, #tpu.memory_space<vmem>>, vector<8x128xf32>
    tpu.vector_store %arg8[%c0_23, %c128], %100 {strides = array<i32>} : memref<8x2688xf32, #tpu.memory_space<vmem>>, vector<8x128xf32>,
    %102 = vector.extract_strided_slice %77 {offsets = [0, 0], sizes = [8, 128], strides = [1, 1]} : vector<8x256xf32> to vector<8x128xf32>
    %103 = vector.extract_strided_slice %77 {offsets = [0, 128], sizes = [8, 128], strides = [1, 1]} : vector<8x256xf32> to vector<8x128xf32>
    %104 = arith.addf %102, %103 : vector<8x128xf32>
    %c0_24 = arith.constant 0 : index
    %c256 = arith.constant 256 : index
    %105 = vector.load %arg8[%c0_24, %c256] : memref<8x2688xf32, #tpu.memory_space<vmem>>, vector<8x128xf32>
    tpu.vector_store %arg8[%c0_24, %c256], %104 {strides = array<i32>} : memref<8x2688xf32, #tpu.memory_space<vmem>>, vector<8x128xf32>,
    %106 = vector.extract_strided_slice %78 {offsets = [0, 0], sizes = [8, 128], strides = [1, 1]} : vector<8x256xf32> to vector<8x128xf32>
    %107 = vector.extract_strided_slice %78 {offsets = [0, 128], sizes = [8, 128], strides = [1, 1]} : vector<8x256xf32> to vector<8x128xf32>
    %108 = arith.addf %106, %107 : vector<8x128xf32>
    %c0_25 = arith.constant 0 : index
    %c384 = arith.constant 384 : index
    %109 = vector.load %arg8[%c0_25, %c384] : memref<8x2688xf32, #tpu.memory_space<vmem>>, vector<8x128xf32>
    tpu.vector_store %arg8[%c0_25, %c384], %108 {strides = array<i32>} : memref<8x2688xf32, #tpu.memory_space<vmem>>, vector<8x128xf32>,
    %110 = vector.extract_strided_slice %79 {offsets = [0, 0], sizes = [8, 128], strides = [1, 1]} : vector<8x256xf32> to vector<8x128xf32>
    %111 = vector.extract_strided_slice %79 {offsets = [0, 128], sizes = [8, 128], strides = [1, 1]} : vector<8x256xf32> to vector<8x128xf32>
    %112 = arith.addf %110, %111 : vector<8x128xf32>
    %c0_26 = arith.constant 0 : index
    %c512 = arith.constant 512 : index
    %113 = vector.load %arg8[%c0_26, %c512] : memref<8x2688xf32, #tpu.memory_space<vmem>>, vector<8x128xf32>
    tpu.vector_store %arg8[%c0_26, %c512], %112 {strides = array<i32>} : memref<8x2688xf32, #tpu.memory_space<vmem>>, vector<8x128xf32>,
    %114 = vector.extract_strided_slice %72 {offsets = [0, 0], sizes = [8, 128], strides = [1, 1]} : vector<8x256xf32> to vector<8x128xf32>
    %115 = vector.extract_strided_slice %72 {offsets = [0, 128], sizes = [8, 128], strides = [1, 1]} : vector<8x256xf32> to vector<8x128xf32>
    %116 = arith.addf %114, %115 : vector<8x128xf32>
    %c0_27 = arith.constant 0 : index
    %c640 = arith.constant 640 : index
    %117 = vector.load %arg8[%c0_27, %c640] : memref<8x2688xf32, #tpu.memory_space<vmem>>, vector<8x128xf32>
    tpu.vector_store %arg8[%c0_27, %c640], %116 {strides = array<i32>} : memref<8x2688xf32, #tpu.memory_space<vmem>>, vector<8x128xf32>,
    %118 = vector.extract_strided_slice %84 {offsets = [0, 0], sizes = [8, 128], strides = [1, 1]} : vector<8x256xf32> to vector<8x128xf32>
    %119 = vector.extract_strided_slice %84 {offsets = [0, 128], sizes = [8, 128], strides = [1, 1]} : vector<8x256xf32> to vector<8x128xf32>
    %120 = arith.addf %118, %119 : vector<8x128xf32>
    %c0_28 = arith.constant 0 : index
    %c768 = arith.constant 768 : index
    %121 = vector.load %arg8[%c0_28, %c768] : memref<8x2688xf32, #tpu.memory_space<vmem>>, vector<8x128xf32>
    tpu.vector_store %arg8[%c0_28, %c768], %120 {strides = array<i32>} : memref<8x2688xf32, #tpu.memory_space<vmem>>, vector<8x128xf32>,
    %122 = vector.extract_strided_slice %85 {offsets = [0, 0], sizes = [8, 128], strides = [1, 1]} : vector<8x256xf32> to vector<8x128xf32>
    %123 = vector.extract_strided_slice %85 {offsets = [0, 128], sizes = [8, 128], strides = [1, 1]} : vector<8x256xf32> to vector<8x128xf32>
    %124 = arith.addf %122, %123 : vector<8x128xf32>
    %c0_29 = arith.constant 0 : index
    %c896 = arith.constant 896 : index
    %125 = vector.load %arg8[%c0_29, %c896] : memref<8x2688xf32, #tpu.memory_space<vmem>>, vector<8x128xf32>
    tpu.vector_store %arg8[%c0_29, %c896], %124 {strides = array<i32>} : memref<8x2688xf32, #tpu.memory_space<vmem>>, vector<8x128xf32>,
    %126 = vector.extract_strided_slice %86 {offsets = [0, 0], sizes = [8, 128], strides = [1, 1]} : vector<8x256xf32> to vector<8x128xf32>
    %127 = vector.extract_strided_slice %86 {offsets = [0, 128], sizes = [8, 128], strides = [1, 1]} : vector<8x256xf32> to vector<8x128xf32>
    %128 = arith.addf %126, %127 : vector<8x128xf32>
    %c0_30 = arith.constant 0 : index
    %c1024 = arith.constant 1024 : index
    %129 = vector.load %arg8[%c0_30, %c1024] : memref<8x2688xf32, #tpu.memory_space<vmem>>, vector<8x128xf32>
    tpu.vector_store %arg8[%c0_30, %c1024], %128 {strides = array<i32>} : memref<8x2688xf32, #tpu.memory_space<vmem>>, vector<8x128xf32>,
    %130 = vector.extract_strided_slice %87 {offsets = [0, 0], sizes = [8, 128], strides = [1, 1]} : vector<8x256xf32> to vector<8x128xf32>
    %131 = vector.extract_strided_slice %87 {offsets = [0, 128], sizes = [8, 128], strides = [1, 1]} : vector<8x256xf32> to vector<8x128xf32>
    %132 = arith.addf %130, %131 : vector<8x128xf32>
    %c0_31 = arith.constant 0 : index
    %c1152 = arith.constant 1152 : index
    %133 = vector.load %arg8[%c0_31, %c1152] : memref<8x2688xf32, #tpu.memory_space<vmem>>, vector<8x128xf32>
    tpu.vector_store %arg8[%c0_31, %c1152], %132 {strides = array<i32>} : memref<8x2688xf32, #tpu.memory_space<vmem>>, vector<8x128xf32>,
    %134 = vector.extract_strided_slice %80 {offsets = [0, 0], sizes = [8, 128], strides = [1, 1]} : vector<8x256xf32> to vector<8x128xf32>
    %135 = vector.extract_strided_slice %80 {offsets = [0, 128], sizes = [8, 128], strides = [1, 1]} : vector<8x256xf32> to vector<8x128xf32>
    %136 = arith.addf %134, %135 : vector<8x128xf32>
    %c0_32 = arith.constant 0 : index
    %c1280 = arith.constant 1280 : index
    %137 = vector.load %arg8[%c0_32, %c1280] : memref<8x2688xf32, #tpu.memory_space<vmem>>, vector<8x128xf32>
    tpu.vector_store %arg8[%c0_32, %c1280], %136 {strides = array<i32>} : memref<8x2688xf32, #tpu.memory_space<vmem>>, vector<8x128xf32>,
    %138 = vector.extract_strided_slice %88 {offsets = [0, 0], sizes = [8, 128], strides = [1, 1]} : vector<8x256xf32> to vector<8x128xf32>
    %139 = vector.extract_strided_slice %88 {offsets = [0, 128], sizes = [8, 128], strides = [1, 1]} : vector<8x256xf32> to vector<8x128xf32>
    %140 = arith.addf %138, %139 : vector<8x128xf32>
    %c0_33 = arith.constant 0 : index
    %c1408 = arith.constant 1408 : index
    %141 = vector.load %arg8[%c0_33, %c1408] : memref<8x2688xf32, #tpu.memory_space<vmem>>, vector<8x128xf32>
    tpu.vector_store %arg8[%c0_33, %c1408], %140 {strides = array<i32>} : memref<8x2688xf32, #tpu.memory_space<vmem>>, vector<8x128xf32>,
    %142 = vector.extract_strided_slice %89 {offsets = [0, 0], sizes = [8, 128], strides = [1, 1]} : vector<8x256xf32> to vector<8x128xf32>
    %143 = vector.extract_strided_slice %89 {offsets = [0, 128], sizes = [8, 128], strides = [1, 1]} : vector<8x256xf32> to vector<8x128xf32>
    %144 = arith.addf %142, %143 : vector<8x128xf32>
    %c0_34 = arith.constant 0 : index
    %c1536 = arith.constant 1536 : index
    %145 = vector.load %arg8[%c0_34, %c1536] : memref<8x2688xf32, #tpu.memory_space<vmem>>, vector<8x128xf32>
    tpu.vector_store %arg8[%c0_34, %c1536], %144 {strides = array<i32>} : memref<8x2688xf32, #tpu.memory_space<vmem>>, vector<8x128xf32>,
    %146 = vector.extract_strided_slice %90 {offsets = [0, 0], sizes = [8, 128], strides = [1, 1]} : vector<8x256xf32> to vector<8x128xf32>
    %147 = vector.extract_strided_slice %90 {offsets = [0, 128], sizes = [8, 128], strides = [1, 1]} : vector<8x256xf32> to vector<8x128xf32>
    %148 = arith.addf %146, %147 : vector<8x128xf32>
    %c0_35 = arith.constant 0 : index
    %c1664 = arith.constant 1664 : index
    %149 = vector.load %arg8[%c0_35, %c1664] : memref<8x2688xf32, #tpu.memory_space<vmem>>, vector<8x128xf32>
    tpu.vector_store %arg8[%c0_35, %c1664], %148 {strides = array<i32>} : memref<8x2688xf32, #tpu.memory_space<vmem>>, vector<8x128xf32>,
    %150 = vector.extract_strided_slice %81 {offsets = [0, 0], sizes = [8, 128], strides = [1, 1]} : vector<8x256xf32> to vector<8x128xf32>
    %151 = vector.extract_strided_slice %81 {offsets = [0, 128], sizes = [8, 128], strides = [1, 1]} : vector<8x256xf32> to vector<8x128xf32>
    %152 = arith.addf %150, %151 : vector<8x128xf32>
    %c0_36 = arith.constant 0 : index
    %c1792 = arith.constant 1792 : index
    %153 = vector.load %arg8[%c0_36, %c1792] : memref<8x2688xf32, #tpu.memory_space<vmem>>, vector<8x128xf32>
    tpu.vector_store %arg8[%c0_36, %c1792], %152 {strides = array<i32>} : memref<8x2688xf32, #tpu.memory_space<vmem>>, vector<8x128xf32>,
    %154 = vector.extract_strided_slice %91 {offsets = [0, 0], sizes = [8, 128], strides = [1, 1]} : vector<8x256xf32> to vector<8x128xf32>
    %155 = vector.extract_strided_slice %91 {offsets = [0, 128], sizes = [8, 128], strides = [1, 1]} : vector<8x256xf32> to vector<8x128xf32>
    %156 = arith.addf %154, %155 : vector<8x128xf32>
    %c0_37 = arith.constant 0 : index
    %c1920 = arith.constant 1920 : index
    %157 = vector.load %arg8[%c0_37, %c1920] : memref<8x2688xf32, #tpu.memory_space<vmem>>, vector<8x128xf32>
    tpu.vector_store %arg8[%c0_37, %c1920], %156 {strides = array<i32>} : memref<8x2688xf32, #tpu.memory_space<vmem>>, vector<8x128xf32>,
    %158 = vector.extract_strided_slice %92 {offsets = [0, 0], sizes = [8, 128], strides = [1, 1]} : vector<8x256xf32> to vector<8x128xf32>
    %159 = vector.extract_strided_slice %92 {offsets = [0, 128], sizes = [8, 128], strides = [1, 1]} : vector<8x256xf32> to vector<8x128xf32>
    %160 = arith.addf %158, %159 : vector<8x128xf32>
    %c0_38 = arith.constant 0 : index
    %c2048 = arith.constant 2048 : index
    %161 = vector.load %arg8[%c0_38, %c2048] : memref<8x2688xf32, #tpu.memory_space<vmem>>, vector<8x128xf32>
    tpu.vector_store %arg8[%c0_38, %c2048], %160 {strides = array<i32>} : memref<8x2688xf32, #tpu.memory_space<vmem>>, vector<8x128xf32>,
    %162 = vector.extract_strided_slice %82 {offsets = [0, 0], sizes = [8, 128], strides = [1, 1]} : vector<8x256xf32> to vector<8x128xf32>
    %163 = vector.extract_strided_slice %82 {offsets = [0, 128], sizes = [8, 128], strides = [1, 1]} : vector<8x256xf32> to vector<8x128xf32>
    %164 = arith.addf %162, %163 : vector<8x128xf32>
    %c0_39 = arith.constant 0 : index
    %c2176 = arith.constant 2176 : index
    %165 = vector.load %arg8[%c0_39, %c2176] : memref<8x2688xf32, #tpu.memory_space<vmem>>, vector<8x128xf32>
    tpu.vector_store %arg8[%c0_39, %c2176], %164 {strides = array<i32>} : memref<8x2688xf32, #tpu.memory_space<vmem>>, vector<8x128xf32>,
    %166 = vector.extract_strided_slice %93 {offsets = [0, 0], sizes = [8, 128], strides = [1, 1]} : vector<8x256xf32> to vector<8x128xf32>
    %167 = vector.extract_strided_slice %93 {offsets = [0, 128], sizes = [8, 128], strides = [1, 1]} : vector<8x256xf32> to vector<8x128xf32>
    %168 = arith.addf %166, %167 : vector<8x128xf32>
    %c0_40 = arith.constant 0 : index
    %c2304 = arith.constant 2304 : index
    %169 = vector.load %arg8[%c0_40, %c2304] : memref<8x2688xf32, #tpu.memory_space<vmem>>, vector<8x128xf32>
    tpu.vector_store %arg8[%c0_40, %c2304], %168 {strides = array<i32>} : memref<8x2688xf32, #tpu.memory_space<vmem>>, vector<8x128xf32>,
    %170 = vector.extract_strided_slice %83 {offsets = [0, 0], sizes = [8, 128], strides = [1, 1]} : vector<8x256xf32> to vector<8x128xf32>
    %171 = vector.extract_strided_slice %83 {offsets = [0, 128], sizes = [8, 128], strides = [1, 1]} : vector<8x256xf32> to vector<8x128xf32>
    %172 = arith.addf %170, %171 : vector<8x128xf32>
    %c0_41 = arith.constant 0 : index
    %c2432 = arith.constant 2432 : index
    %173 = vector.load %arg8[%c0_41, %c2432] : memref<8x2688xf32, #tpu.memory_space<vmem>>, vector<8x128xf32>
    tpu.vector_store %arg8[%c0_41, %c2432], %172 {strides = array<i32>} : memref<8x2688xf32, #tpu.memory_space<vmem>>, vector<8x128xf32>,
    %174 = vector.extract_strided_slice %73 {offsets = [0, 0], sizes = [8, 128], strides = [1, 1]} : vector<8x256xf32> to vector<8x128xf32>
    %175 = vector.extract_strided_slice %73 {offsets = [0, 128], sizes = [8, 128], strides = [1, 1]} : vector<8x256xf32> to vector<8x128xf32>
    %176 = arith.addf %174, %175 : vector<8x128xf32>
    %c0_42 = arith.constant 0 : index
    %c2560 = arith.constant 2560 : index
    %177 = vector.load %arg8[%c0_42, %c2560] : memref<8x2688xf32, #tpu.memory_space<vmem>>, vector<8x128xf32>
    tpu.vector_store %arg8[%c0_42, %c2560], %176 {strides = array<i32>} : memref<8x2688xf32, #tpu.memory_space<vmem>>, vector<8x128xf32>,
    %c0_43 = arith.constant 0 : index
    %c0_44 = arith.constant 0 : index
    %178 = vector.load %arg8[%c0_43, %c0_44] : memref<8x2688xf32, #tpu.memory_space<vmem>>, vector<8x2688xf32>
    %c0_45 = arith.constant 0 : index
    %c0_46 = arith.constant 0 : index
    %179 = vector.load %arg1[%c0_45, %c0_46] : memref<2688x128xf32, #tpu.memory_space<vmem>>, vector<2688x128xf32>
    %cst_47 = arith.constant dense<0.000000e+00> : vector<8x128xf32>
    %180 = tpu.matmul %178, %179, %cst_47 {dimension_numbers = #tpu.dot_dimension_numbers<[1], [0], [0], [1], [0, 0, 1, 1], [], []>} : vector<8x2688xf32>, vector<2688x128xf32>, vector<8x128xf32> -> vector<8x128xf32>
    %c0_48 = arith.constant 0 : index
    %c0_49 = arith.constant 0 : index
    %181 = vector.load %arg6[%c0_48, %c0_49] : memref<8x128xf32, #tpu.memory_space<vmem>>, vector<8x128xf32>
    tpu.vector_store %arg6[%c0_48, %c0_49], %180 {strides = array<i32>} : memref<8x128xf32, #tpu.memory_space<vmem>>, vector<8x128xf32>,
    return
  }
  func.func @transform_0(%arg0: i32) -> (i32, i32) {
    %c0_i32 = arith.constant 0 : i32
    %c0_i32_0 = arith.constant 0 : i32
    %c0_i32_1 = arith.constant 0 : i32
    return %c0_i32, %c0_i32_0 : i32, i32
  }
  func.func @transform_1(%arg0: i32) -> (i32, i32) {
    %c0_i32 = arith.constant 0 : i32
    %c0_i32_0 = arith.constant 0 : i32
    %c0_i32_1 = arith.constant 0 : i32
    return %c0_i32, %c0_i32_0 : i32, i32
  }
  func.func @transform_2(%arg0: i32) -> (i32, i32) {
    %c0_i32 = arith.constant 0 : i32
    %c0_i32_0 = arith.constant 0 : i32
    %c0_i32_1 = arith.constant 0 : i32
    return %c0_i32, %c0_i32_0 : i32, i32
  }
  func.func @transform_3(%arg0: i32) -> (i32, i32) {
    %c0_i32 = arith.constant 0 : i32
    %c0_i32_0 = arith.constant 0 : i32
    return %arg0, %c0_i32 : i32, i32
  }
  func.func @transform_4(%arg0: i32) -> (i32, i32) {
    %c0_i32 = arith.constant 0 : i32
    %c0_i32_0 = arith.constant 0 : i32
    return %arg0, %c0_i32 : i32, i32
  }
  func.func @transform_5(%arg0: i32) -> (i32, i32) {
    %c0_i32 = arith.constant 0 : i32
    %c0_i32_0 = arith.constant 0 : i32
    return %arg0, %c0_i32 : i32, i32
  }
  func.func @transform_6(%arg0: i32) -> (i32, i32) {
    %c0_i32 = arith.constant 0 : i32
    %c0_i32_0 = arith.constant 0 : i32
    return %arg0, %c0_i32 : i32, i32
  }
}

</mosaic_0001>

<bundles_post_ra>
// kernel: custom-call.83
= control target key start
LH: loop header
LB: loop body
LE: loop exit
PB: predicated region body
PF: predicated region fallthrough
CT: control target
= control target key end

     0   :  { %5 = vsyncpa [#allocation3], 0  ;;  %s875_s0 = inlined_call_operand.vmem [shape: f32[8,5,5], index: 0, kind: input, shape index: {}]   ;;  %s876_s1 = inlined_call_operand.vmem [shape: f32[8,5,5], index: 1, kind: output, shape index: {0}]   ;;  %s877_s2 = inlined_call_operand.hbm [shape: s32[8,5], index: 2, kind: output, shape index: {1}]   ;;  %s878_s3 = inlined_call_operand.vmem [shape: s32[8,5], index: 3, kind: output, shape index: {2}]  }
   0x1   :  { %7 = vsyncpa [#allocation3 + $0x1], 0  ;;  %s696_s12 = smov 0   ;;  %s698_s13 = smov 0  }
   0x2   :  { %s700_s14 = smov 0   ;;  %s702_s15 = smov 0  }
   0x3 LB: > { %s717_s16 = sadd.s32 4294967295, %s668_s15   ;;  %s531_s17 = sadd.s32 4294967294, %s668_s15   ;;  %s668_s15 = sphi %s702_s15, %s884_s15   ;;  %s664_s14 = sphi %s700_s14, %s883_s14   ;;  %s660_s13 = sphi %s698_s13, %s882_s13   ;;  %s656_s12 = sphi %s696_s12, %s881_s12  }
   0x4   : > { %s721_s18 = sadd.s32 1, %s668_s15   ;;  %s17_s19 = sshrl.u32 %s668_s15, 3 }
   0x5   : > { %s18_s20 = sshrl.u32 %s721_s18, 3  ;;  %s22_s21 = sadd.s32 1, %s664_s14 }
   0x6   : > { %s19_s22 = ssub.s32 %s17_s19, %s18_s20  ;;  %p32_p0 = scmp.ne.s32.totalorder %s664_s14, %s660_s13 }
   0x7   : > { %p20_p1 = scmp.eq.s32.totalorder %s19_s22, 0  ;;  %p33_p2 = scmp.eq.s32.totalorder %s717_s16, 7 }
   0x8   : > { %p38_p3 = scmp.ne.s32.totalorder %s660_s13, %s656_s12  ;;  %p39_p4 = scmp.eq.s32.totalorder %s531_s17, 7 }
   0x9   : > { %s732_s23 = scalar_select %p20_p1, %s664_s14, %s22_s21  }
   0xa   : > { %p734_p5 = por %p33_p2, %p32_p0  ;;  %p738_p6 = por %p39_p4, %p38_p3 }
   0xb   : > { %p533_p7 = scmp.ge.s32.totalorder %s668_s15, 8 }
   0xc   : > { %s85_s26 = sand.u32 (!%p533_p7), 1, %s668_s15   ;;  %s535_s27 = sshll.u32 (!%p533_p7), %s668_s15, 3 }
   0xd   : > { %83 = sbr.rel (%p533_p7) target bundleno = 20 (0x14), region = 16  ;;  %s534_s28 = sshll.u32 (!%p533_p7), %s85_s26, 3 }
   0xe   : > { %s89_s4 = scalar_lea.vmem (!%p533_p7), %s875_s0, %s535_s27  ;;  %s87_s5 = scalar_lea.vmem (!%p533_p7), [#allocation0], %s534_s28 }
   0xf   : > { %v117_v0 = vld [vmem:[%s89_s4] sm:$0xff] (!%p533_p7) }
  0x10   : > { %118 = vst [vmem:[%s87_s5] sm:$0xff] (!%p533_p7), %v117_v0 }
  0x14 PF: > { %p536_p8 = scmp.ge.s32.totalorder %s668_s15, 1  ;;  %p123_p9 = scmp.lt.s32.totalorder %s668_s15, 9 }
  0x16   : > { %p124_p10 = pnand %p536_p8, %p123_p9 }
  0x18   : > { %127 = sbr.rel (%p124_p10) target bundleno = 433 (0x1b1), region = 54 }
  0x1f   : > { %s130_s6 = sand.u32 1, %s717_s16   ;;  %s145_s7 = sand.u32 1, %s660_s13   ;;  %v163_v1 = vlaneseq  ;;  %v674_v4 = vmov 0  }
  0x20   : > { %s537_s8 = sshll.u32 %s130_s6, 3  ;;  %s754_s9 = sshll.u32 %s145_s7, 3 }
  0x21   : > { %v757_v2 = vshrl.u32 %v163_v1, 7  ;;  %s132_s10 = scalar_lea.vmem [#allocation0], %s537_s8  ;;  %s759_s11 = scalar_lea.vmem [#allocation1], %s537_s8 }
  0x22   : > { %v156_v3 = vld [vmem:[%s132_s10] sm:$0xff]  ;;  %s158_s17 = sand.u32 7, %s717_s16   ;;  %s147_s19 = scalar_lea.vmem [#allocation2], %s754_s9 }
  0x23   : > { %157 = vst [vmem:[%s759_s11] sm:$0xff] %v156_v3  ;;  %167 = vst [vmem:[#allocation5] sm:$0xff] %v757_v2  ;;  %s767_s20 = scalar_lea.vmem %s147_s19, %s158_s17 [#allocation2]  ;;  %s153_s21 = scalar_lea.vmem [#allocation4], %s754_s9 }
  0x24   : > { %s772_s22 = scalar_lea.vmem %s153_s21, %s158_s17 [#allocation4]  ;;  %162 = vst [vmem:[%s767_s20] sm:$0x1] %v674_v4  ;;  %s775_s26 = smov 0  }
  0x25 LB: >> { %vm183_vm0 = vcmp.lt.s32.totalorder %v757_v2, 5  ;;  %v783_v7 = vstv %s672_s26  ;;  %s224_s27 = ssub.s32 128, %s672_s26  ;;  %v230_v37 = vand.u32 127, %v163_v1  ;;  %s236_s28 = scalar_lea.vmem %s759_s11, %s672_s26 [#allocation1]  ;;  %s672_s26 = sphi %s775_s26, %s173_s26  }
  0x26   : >> { %vm182_vm1 = vcmp.ge.s32.totalorder %v757_v2, %v783_v7  ;;  %s242_s30 = scalar_lea.vmem [#allocation5], %s672_s26  ;;  %vm262_vm15 = vcmp.gt.s32.totalorder %v757_v2, %v783_v7  ;;  %s173_s26 = sadd.s32 1, %s672_s26  }
  0x27   : >> { %vm184_vm3 = vmand %vm182_vm1, %vm183_vm0  ;;  %vm254_vm12 = vcmp.gt.s32.totalorder %v230_v37, %v783_v7  ;;  %vm231_vm13 = vcmp.eq.s32.totalorder %v230_v37, %v783_v7  ;;  %p170_p11 = scmp.ge.s32.totalorder %s173_s26, 5  }
  0x28   : >> { %vm266_vm1 = vmand %vm262_vm15, %vm231_vm13  ;;  %s545_s6 = sshll.u32 (%p170_p11), %s717_s16, 3  ;;  %s372_s8 = sshrl.u32 (%p170_p11), %s717_s16, 3 }
  0x29   : > { %s546_s26 = sshll.u32 (%p170_p11), %s372_s8, 7 }
  0x2a   : >> { %v178_v5 = vld [vmem:[%s759_s11] sm:$0xff]  ;;  %v238_v40 = vld [vmem:[%s236_s28] ss:$0 sm:$0xff] }
  0x2b   : >> { %v179_v6 = vand.u32 2147483647, %v178_v5  ;;  %v233_v39 = vld [vmem:[%s767_s20] ss:$0 sm:$0xff] }
  0x2c   : >> { %v244_v41 = vld [vmem:[%s242_s30] ss:$0 sm:$0xff] }
  0x2d   : >> { %vm541_vm2 = vcmp.gt.f32.partialorder %v179_v6, -inf }
  0x2e   : >> { %vm186_vm4 = vmand %vm184_vm3, %vm541_vm2 }
  0x2f   : >> { %v187_v8 = vsel %vm186_vm4, %v757_v2, %v783_v7  ;;  %v188_v9 = vsel %vm186_vm4, %v179_v6, -inf }
  0x30   : >> { %v189_v10 = vrot.slane %v188_v9, 1  ;;  %v190_v11 = vrot.slane %v187_v8, 1 }
  0x32   : >> { %vm191_vm5 = vcmp.ge.f32.partialorder %v189_v10, %v188_v9  ;;  %v194_v12 = vrot.slane %v189_v10, 1  ;;  %v195_v13 = vrot.slane %v190_v11, 1 }
  0x33   : >> { %v192_v14 = vsel %vm191_vm5, %v189_v10, %v188_v9  ;;  %v193_v15 = vsel %vm191_vm5, %v190_v11, %v187_v8 }
  0x34   : >> { %vm196_vm6 = vcmp.ge.f32.partialorder %v194_v12, %v192_v14  ;;  %v199_v16 = vrot.slane %v194_v12, 1  ;;  %v200_v17 = vrot.slane %v195_v13, 1 }
  0x35   : >> { %v197_v18 = vsel %vm196_vm6, %v194_v12, %v192_v14  ;;  %v198_v19 = vsel %vm196_vm6, %v195_v13, %v193_v15 }
  0x36   : >> { %vm201_vm7 = vcmp.ge.f32.partialorder %v199_v16, %v197_v18  ;;  %v204_v20 = vrot.slane %v199_v16, 1  ;;  %v205_v21 = vrot.slane %v200_v17, 1 }
  0x37   : >> { %v202_v22 = vsel %vm201_vm7, %v199_v16, %v197_v18  ;;  %v203_v23 = vsel %vm201_vm7, %v200_v17, %v198_v19 }
  0x38   : >> { %vm206_vm8 = vcmp.ge.f32.partialorder %v204_v20, %v202_v22  ;;  %v209_v24 = vrot.slane %v204_v20, 1  ;;  %v210_v25 = vrot.slane %v205_v21, 1 }
  0x39   : >> { %v207_v26 = vsel %vm206_vm8, %v204_v20, %v202_v22  ;;  %v208_v27 = vsel %vm206_vm8, %v205_v21, %v203_v23 }
  0x3a   : >> { %vm211_vm9 = vcmp.ge.f32.partialorder %v209_v24, %v207_v26  ;;  %v214_v28 = vrot.slane %v209_v24, 1  ;;  %v215_v29 = vrot.slane %v210_v25, 1 }
  0x3b   : >> { %v212_v30 = vsel %vm211_vm9, %v209_v24, %v207_v26  ;;  %v213_v31 = vsel %vm211_vm9, %v210_v25, %v208_v27 }
  0x3c   : >> { %vm216_vm10 = vcmp.ge.f32.partialorder %v214_v28, %v212_v30  ;;  %v219_v32 = vrot.slane %v214_v28, 1  ;;  %v220_v33 = vrot.slane %v215_v29, 1 }
  0x3d   : >> { %v217_v34 = vsel %vm216_vm10, %v214_v28, %v212_v30  ;;  %v218_v35 = vsel %vm216_vm10, %v215_v29, %v213_v31 }
  0x3e   : >> { %vm221_vm11 = vcmp.ge.f32.partialorder %v219_v32, %v217_v34 }
  0x3f   : >> { %v223_v36 = vsel %vm221_vm11, %v220_v33, %v218_v35 }
  0x40   : >> { %225 = vrot.lane.b32.xlu0 %v223_v36, %s224_s27  ;;  %s336_s27 = scalar_lea.vmem (%p170_p11), %s876_s1, %s545_s6  ;;  %s675_s6 = smov (%p170_p11), [#allocation2]  }
  0xb2   : >> { %v226_v38 = vpop.permute.xlu0 %225 }
  0xb3   : >> { %550 = vpush %v226_v38 }
  0xe4   : >> { %s551_s29 = spop %550 }
  0xe5   : >> { %v232_v42 = vstv %s551_s29  ;;  %s237_s4 = scalar_lea.vmem %s759_s11, %s551_s29 [#allocation1]  ;;  %s243_s5 = scalar_lea.vmem [#allocation5], %s551_s29 }
  0xe6   : >> { %v239_v43 = vld [vmem:[%s237_s4] ss:$0 sm:$0xff]  ;;  %v234_v45 = vsel %vm231_vm13, %v232_v42, %v233_v39 }
  0xe7   : >> { %v245_v44 = vld [vmem:[%s243_s5] ss:$0 sm:$0xff]  ;;  %240 = vst [vmem:[%s237_s4] sm:$0x1] %v238_v40  ;;  %vm248_vm14 = vcmp.ne.f32.partialorder %v239_v43, 0.0  ;;  %235 = vst [vmem:[%s767_s20] sm:$0x1] %v234_v45  ;;  %v255_v52 = vsel %vm254_vm12, %v239_v43, 0.0 }
  0xe8   : >> { %246 = vst [vmem:[%s243_s5] sm:$0x1] %v244_v41  ;;  %241 = vst [vmem:[%s236_s28] sm:$0x1] %v239_v43  ;;  %s379_s20 = sshll.u32 (%p170_p11), %s147_s19, 4  ;;  %s327_s4 = scalar_lea.sflag (%p170_p11), [#allocation3], %s145_s7  ;;  %s380_s20 = int_to_ptr.vmem [resolvable:$true] %s379_s20 }
  0xe9   : >> { %247 = vst [vmem:[%s242_s30] sm:$0x1] %v245_v44  ;;  %vm249_vm0 = vmand %vm231_vm13, %vm248_vm14  ;;  %s827_s30 = scalar_lea.hbm (%p170_p11), %s877_s2, %s546_s26  ;;  %s602_s5 = scalar_lea.vmem (%p170_p11), %s380_s20, 128 }
  0xea   : >> { %v250_v46 = vsel %vm249_vm0, %v239_v43, 1.0  ;;  %p603_p12 = scmp.ne.s32.totalorder (%p170_p11), %s380_s20, %s602_s5 }
  0xeb   : >> { %v263_v47 = vsel %vm262_vm15, %v250_v46, 1.0 }
  0xec   : >> { %600 = vrcp.f32 %v263_v47  ;;  %p604_p13 = pnand (%p170_p11), %p603_p12, %p734_p5 }
  0xee   : > { %p605_p0 = pneg (%p170_p11), %p604_p13 }
  0xef   : >> { %v259_v49 = vld [vmem:[%s759_s11] sm:$0xff] }
  0xf0   : > { %v273_v56 = vld [vmem:[#allocation5] sm:$0xff] (%p170_p11) }
  0xf6   : >> { %v601_v48 = vpop.eup %600 }
  0xf7   : >> { %v265_v50 = vmul.f32 %v601_v48, %v259_v49 }
  0xf9   : >> { %v267_v51 = vsel %vm266_vm1, %v265_v50, 0.0 }
  0xfa   : >> { %268 = vadd.xlane.f32.xlu0 %v267_v51 }
 0x127   : > { %289 = vxpose.xlu0.b32.start.end [1/1] (short) (narrow) (%p170_p11), %v273_v56, 8 }
 0x186   : > { %172 = sbr.rel (!%p170_p11) target bundleno = 37 (0x25), region = 214 }
 0x187   : >> { %v269_v53 = vpop.xlane.xlu0 %268 }
 0x188   : >> { %v270_v54 = vmul.f32 %v269_v53, %v255_v52 }
 0x18a   : >> { %v271_v55 = vsub.f32 %v265_v50, %v270_v54 }
 0x18c   : >> { %272 = vst [vmem:[%s759_s11] sm:$0xff] %v271_v55 }
 0x193   : > { %v364_v57 = vld [vmem:[%s759_s11] sm:$0xff]  ;;  %s606_s11 = sshll.u32 %s675_s6, 4  ;;  %s607_s11 = int_to_ptr.vmem [resolvable:$false] %s606_s11 }
 0x194   : > { %365 = vst [vmem:[%s336_s27] sm:$0xff] %v364_v57  ;;  %s608_s10 = scalar_lea.vmem %s607_s11, 256  ;;  %p609_p1 = scmp.lt.s32.totalorder %s380_s20, %s607_s11 }
 0x195   : > { %p610_p2 = scmp.lt.s32.totalorder %s608_s10, %s602_s5 }
 0x197   : > { %p611_p3 = por %p610_p2, %p609_p1 }
 0x199   : > { %p612_p4 = pnand %p611_p3, %p605_p0 }
 0x19b   : > { %615 = shalt.err (!%p612_p4)
}
 0x19c   : > { %s616_s7 = scalar_lea.hbm %s827_s30, 128  ;;  %s620_s27 = scalar_lea.hbm %s877_s2, 128 }
 0x19d   : > { %p617_p7 = scmp.ne.s32.totalorder %s827_s30, %s616_s7  ;;  %p621_p10 = scmp.lt.u32.totalorder %s827_s30, %s877_s2 }
 0x19e   : > { %p622_p11 = scmp.lt.u32.totalorder %s620_s27, %s616_s7  ;;  %p624_p13 = scmp.lt.u32.totalorder %s616_s7, %s827_s30 }
 0x19f   : > { %p618_p8 = pnand %p617_p7, %p734_p5 }
 0x1a0   : > { %p623_p12 = por %p622_p11, %p621_p10 }
 0x1a1   : > { %p619_p9 = pneg %p618_p8 }
 0x1a2   : > { %p625_p0 = por %p624_p13, %p623_p12 }
 0x1a4   : > { %p626_p1 = pnand %p625_p0, %p619_p9 }
 0x1a6   : > { %629 = shalt.err (!%p626_p1)
}
 0x1a7   : > { %552 = dma.vmem_to_hbm [thread:$0]  (%p734_p5), %s380_s20, 128, %s827_s30, %s327_s4   ;;  %v305_v58 = vpop.trf.xlu0 }
 0x1a8   : > { %321 = vst [vmem:[%s772_s22] sm:$0x1] %v305_v58  ;;  %385 = sbr.rel (!%p734_p5) target bundleno = 433 (0x1b1), region = 104  ;;  %s547_s29 = sshll.u32 (%p734_p5), %s372_s8, 3 }
 0x1a9   : > { %s388_s11 = scalar_lea.vmem (%p734_p5), %s878_s3, %s547_s29 }
 0x1af   : > { %v416_v59 = vld [vmem:[%s153_s21] sm:$0xff] }
 0x1b0   : > { %417 = vst [vmem:[%s388_s11] sm:$0xff] %v416_v59 }
 0x1b1 PF: > { %p558_p2 = scmp.ge.s32.totalorder %s668_s15, 2  ;;  %s433_s22 = sand.u32 1, %s656_s12  }
 0x1b2   : > { %s434_s24 = scalar_lea.sflag [#allocation3], %s433_s22 }
 0x1b3   : > { %p555_p5 = pnand %p558_p2, %p738_p6 }
 0x1b5   : > { %651 = dma.done.wait (!%p555_p5), %s434_s24, 128  }
 0x1b6   : > { %653 = vsyncadd (!%p555_p5), %s434_s24, 4294967168  ;;  %p10_p3 = scmp.ge.s32.totalorder %s721_s18, 10   ;;  %s881_s12 = smov %s660_s13 }
 0x1b7   : > { %s882_s13 = smov %s664_s14  ;;  %s883_s14 = smov %s732_s23 }
 0x1b8   : > { %s884_s15 = smov %s721_s18  ;;  %12 = sbr.rel (!%p10_p3) target bundleno = 3 (0x3), region = 225 }
 0x1bf   :  { %446 = vsyncpa [#allocation3], 1 }
 0x1c0   :  { %448 = vsyncpa [#allocation3 + $0x1], 1 }

// kernel: custom-call.85
= control target key start
LH: loop header
LB: loop body
LE: loop exit
PB: predicated region body
PF: predicated region fallthrough
CT: control target
= control target key end

     0   :  { %s355_s6 = smov 0   ;;  %s357_s7 = smov 0   ;;  %s395_s0 = inlined_call_operand.vmem [shape: f32[8,1,5,5], index: 0, kind: input, shape index: {}]   ;;  %s396_s1 = inlined_call_operand.vmem [shape: f32[8,1,5,5], index: 1, kind: output, shape index: {}]  }
   0x1   :  { %s359_s8 = smov 0  }
   0x2 LB: > { %s281_s9 = sadd.s32 4294967295, %s342_s8   ;;  %s33_s10 = sadd.s32 1, %s338_s7  ;;  %s342_s8 = sphi %s359_s8, %s7_s8   ;;  %s338_s7 = sphi %s357_s7, %s398_s7   ;;  %s334_s6 = sphi %s355_s6, %s397_s6  }
   0x3   : > { %p35_p0 = scmp.ge.s32.totalorder %s33_s10, 8  ;;  %p283_p1 = scmp.ge.s32.totalorder %s342_s8, 8 }
   0x4   : > { %s49_s11 = sand.u32 (!%p283_p1), 1, %s342_s8   ;;  %s285_s12 = sshll.u32 (!%p283_p1), %s338_s7, 3 }
   0x5   : > { %s400_s10 = smov (%p35_p0, %s33_s10), 0  ;;  %47 = sbr.rel (%p283_p1) target bundleno = 12 (0xc), region = 16 }
   0x6   : > { %s284_s13 = sshll.u32 (!%p283_p1), %s49_s11, 3  ;;  %s56_s16 = scalar_lea.vmem (!%p283_p1), %s395_s0, %s285_s12 }
   0x7   : > { %v84_v0 = vld [vmem:[%s56_s16] sm:$0xff] (!%p283_p1)  ;;  %s51_s17 = scalar_lea.vmem (!%p283_p1), [#allocation0], %s284_s13 }
   0x8   : > { %85 = vst [vmem:[%s51_s17] sm:$0xff] (!%p283_p1), %v84_v0 }
   0xc PF: > { %p286_p2 = scmp.ge.s32.totalorder %s342_s8, 1  ;;  %p90_p3 = scmp.lt.s32.totalorder %s342_s8, 9 }
   0xe   : > { %p91_p4 = pnand %p286_p2, %p90_p3 }
  0x10   : > { %94 = sbr.rel (%p91_p4) target bundleno = 778 (0x30a), region = 54 }
  0x17   : > { %s97_s18 = sand.u32 1, %s281_s9   ;;  %v108_v1 = vlaneseq  ;;  %v344_v10 = vmov -1.0   ;;  %s290_s21 = sshll.u32 %s334_s6, 3 }
  0x18   : > { %s287_s19 = sshll.u32 %s97_s18, 3  ;;  %s189_s24 = scalar_lea.vmem %s396_s1, %s290_s21 }
  0x19   : > { %v109_v2 = vand.u32 127, %v108_v1  ;;  %v112_v3 = vshrl.u32 %v108_v1, 7  ;;  %s99_s20 = scalar_lea.vmem [#allocation0], %s287_s19 }
  0x1a   : > { %v115_v4 = vld [vmem:[%s99_s20] sm:$0xff] }
  0x1b   : > { %vm110_vm0 = vcmp.lt.s32.totalorder %v109_v2, 5  ;;  %vm114_vm1 = vcmp.eq.s32.totalorder %v112_v3, %v109_v2  ;;  %vm119_vm2 = vcmp.ge.s32.totalorder %v112_v3, %v109_v2  ;;  %vm133_vm4 = vcmp.eq.s32.totalorder %v109_v2, 0 }
  0x1c   : > { %v116_v5 = vsel %vm114_vm1, %v115_v4, 0.0  ;;  %vm120_vm3 = vmand %vm119_vm2, %vm110_vm0  ;;  %vm130_vm5 = vcmp.eq.s32.totalorder %v109_v2, %v112_v3  ;;  %v134_v11 = vsel %vm133_vm4, 1.0, %v344_v10  ;;  %vm141_vm6 = vcmp.eq.s32.totalorder %v109_v2, 1 }
  0x1d   : > { %v121_v6 = vsel %vm120_vm3, %v115_v4, 0.0  ;;  %117 = vadd.xlane.f32.xlu0 %v116_v5  ;;  %v135_v12 = vsel %vm130_vm5, %v134_v11, 0.0  ;;  %vm151_vm7 = vcmp.eq.s32.totalorder %v109_v2, 2  ;;  %vm161_vm8 = vcmp.eq.s32.totalorder %v109_v2, 3 }
  0x1e   : > { %vm171_vm9 = vcmp.eq.s32.totalorder %v109_v2, 4 }
  0xaa   : > { %v118_v7 = vpop.xlane.xlu0 %117 }
  0xab   : > { %318 = vrcp.f32 %v118_v7  ;;  %vm178_vm10 = vweird.f32 %v118_v7 }
  0xb5   : > { %v319_v8 = vpop.eup %318 }
  0xb6   : > { %v123_v9 = vmul.f32 %v319_v8, %v121_v6 }
  0xb8   : > { %124 = vst [vmem:[#allocation2] sm:$0xff] %v123_v9 }
  0xbf   : > { %v137_v13 = vld [vmem:[#allocation2 + $0x1] ss:$0 sm:$0xff]  ;;  %v147_v16 = vld [vmem:[#allocation2 + $0x2] ss:$0 sm:$0xff]  ;;  %v157_v21 = vld [vmem:[#allocation2 + $0x3] ss:$0 sm:$0xff] }
  0xc0   : > { %v138_v14 = vxor.u32 2147483648, %v137_v13  ;;  %v148_v18 = vxor.u32 2147483648, %v147_v16  ;;  %v158_v23 = vxor.u32 2147483648, %v157_v21  ;;  %v167_v26 = vld [vmem:[#allocation2 + $0x4] ss:$0 sm:$0xff] }
  0xc1   : > { %v168_v28 = vxor.u32 2147483648, %v167_v26 }
  0xc2   : > { %v142_v15 = vmul.f32 %v138_v14, %v135_v12 }
  0xc4   : > { %143 = vadd.xlane.f32.xlu0 %v142_v15 }
 0x151   : > { %v144_v17 = vpop.xlane.xlu0 %143 }
 0x152   : > { %v145_v19 = vsel %vm141_vm6, %v144_v17, %v135_v12 }
 0x153   : > { %v152_v20 = vmul.f32 %v148_v18, %v145_v19 }
 0x155   : > { %153 = vadd.xlane.f32.xlu1 %v152_v20 }
 0x1e2   : > { %v154_v22 = vpop.xlane.xlu1 %153 }
 0x1e3   : > { %v155_v24 = vsel %vm151_vm7, %v154_v22, %v145_v19 }
 0x1e4   : > { %v162_v25 = vmul.f32 %v158_v23, %v155_v24 }
 0x1e6   : > { %163 = vadd.xlane.f32.xlu1 %v162_v25 }
 0x273   : > { %v164_v27 = vpop.xlane.xlu1 %163 }
 0x274   : > { %v165_v29 = vsel %vm161_vm8, %v164_v27, %v155_v24 }
 0x275   : > { %v172_v30 = vmul.f32 %v168_v28, %v165_v29 }
 0x277   : > { %173 = vadd.xlane.f32.xlu0 %v172_v30 }
 0x304   : > { %v174_v31 = vpop.xlane.xlu0 %173 }
 0x305   : > { %v175_v32 = vsel %vm171_vm9, %v174_v31, %v165_v29 }
 0x306   : > { %v177_v33 = vmul.f32 %v319_v8, %v175_v32 }
 0x308   : > { %v179_v34 = vsel %vm178_vm10, %v175_v32, %v177_v33 }
 0x309   : > { %218 = vst [vmem:[%s189_s24] sm:$0xff] %v179_v34 }
 0x30a PF: > { %s7_s8 = sadd.s32 1, %s342_s8   ;;  %s397_s6 = smov %s338_s7 }
 0x30b   : > { %p4_p5 = scmp.ge.s32.totalorder %s7_s8, 10   ;;  %s398_s7 = smov %s400_s10 }
 0x30d   :  { %6 = sbr.rel (!%p4_p5) target bundleno = 2 (0x2), region = 122 }

// kernel: custom-call.84
= control target key start
LH: loop header
LB: loop body
LE: loop exit
PB: predicated region body
PF: predicated region fallthrough
CT: control target
= control target key end

     0   :  { %s354_s6 = smov 0   ;;  %s356_s7 = smov 0   ;;  %s394_s0 = inlined_call_operand.vmem [shape: f32[8,1,5,5], index: 0, kind: input, shape index: {}]   ;;  %s395_s1 = inlined_call_operand.vmem [shape: f32[8,1,5,5], index: 1, kind: output, shape index: {}]  }
   0x1   :  { %s358_s8 = smov 0  }
   0x2 LB: > { %s280_s9 = sadd.s32 4294967295, %s341_s8   ;;  %s33_s10 = sadd.s32 1, %s337_s7  ;;  %s341_s8 = sphi %s358_s8, %s7_s8   ;;  %s337_s7 = sphi %s356_s7, %s397_s7   ;;  %s333_s6 = sphi %s354_s6, %s396_s6  }
   0x3   : > { %p35_p0 = scmp.ge.s32.totalorder %s33_s10, 8  ;;  %p282_p1 = scmp.ge.s32.totalorder %s341_s8, 8 }
   0x4   : > { %s49_s11 = sand.u32 (!%p282_p1), 1, %s341_s8   ;;  %s284_s12 = sshll.u32 (!%p282_p1), %s337_s7, 3 }
   0x5   : > { %s399_s10 = smov (%p35_p0, %s33_s10), 0  ;;  %47 = sbr.rel (%p282_p1) target bundleno = 12 (0xc), region = 16 }
   0x6   : > { %s283_s13 = sshll.u32 (!%p282_p1), %s49_s11, 3  ;;  %s56_s16 = scalar_lea.vmem (!%p282_p1), %s394_s0, %s284_s12 }
   0x7   : > { %v84_v0 = vld [vmem:[%s56_s16] sm:$0xff] (!%p282_p1)  ;;  %s51_s17 = scalar_lea.vmem (!%p282_p1), [#allocation0], %s283_s13 }
   0x8   : > { %85 = vst [vmem:[%s51_s17] sm:$0xff] (!%p282_p1), %v84_v0 }
   0xc PF: > { %p285_p2 = scmp.ge.s32.totalorder %s341_s8, 1  ;;  %p90_p3 = scmp.lt.s32.totalorder %s341_s8, 9 }
   0xe   : > { %p91_p4 = pnand %p285_p2, %p90_p3 }
  0x10   : > { %94 = sbr.rel (%p91_p4) target bundleno = 778 (0x30a), region = 54 }
  0x17   : > { %s97_s18 = sand.u32 1, %s280_s9   ;;  %v108_v1 = vlaneseq  ;;  %v343_v10 = vmov -1.0   ;;  %s289_s21 = sshll.u32 %s333_s6, 3 }
  0x18   : > { %s286_s19 = sshll.u32 %s97_s18, 3  ;;  %s188_s24 = scalar_lea.vmem %s395_s1, %s289_s21 }
  0x19   : > { %v109_v2 = vand.u32 127, %v108_v1  ;;  %v112_v3 = vshrl.u32 %v108_v1, 7  ;;  %s99_s20 = scalar_lea.vmem [#allocation0], %s286_s19 }
  0x1a   : > { %v115_v4 = vld [vmem:[%s99_s20] sm:$0xff] }
  0x1b   : > { %vm110_vm0 = vcmp.lt.s32.totalorder %v109_v2, 5  ;;  %vm114_vm1 = vcmp.eq.s32.totalorder %v112_v3, %v109_v2  ;;  %vm119_vm2 = vcmp.le.s32.totalorder %v112_v3, %v109_v2  ;;  %vm133_vm4 = vcmp.eq.s32.totalorder %v109_v2, 4 }
  0x1c   : > { %v116_v5 = vsel %vm114_vm1, %v115_v4, 0.0  ;;  %vm120_vm3 = vmand %vm119_vm2, %vm110_vm0  ;;  %vm130_vm5 = vcmp.eq.s32.totalorder %v109_v2, %v112_v3  ;;  %v134_v11 = vsel %vm133_vm4, 1.0, %v343_v10  ;;  %vm141_vm6 = vcmp.eq.s32.totalorder %v109_v2, 3 }
  0x1d   : > { %v121_v6 = vsel %vm120_vm3, %v115_v4, 0.0  ;;  %117 = vadd.xlane.f32.xlu0 %v116_v5  ;;  %v135_v12 = vsel %vm130_vm5, %v134_v11, 0.0  ;;  %vm151_vm7 = vcmp.eq.s32.totalorder %v109_v2, 2  ;;  %vm161_vm8 = vcmp.eq.s32.totalorder %v109_v2, 1 }
  0x1e   : > { %vm170_vm9 = vcmp.eq.s32.totalorder %v109_v2, 0 }
  0xaa   : > { %v118_v7 = vpop.xlane.xlu0 %117 }
  0xab   : > { %317 = vrcp.f32 %v118_v7  ;;  %vm177_vm10 = vweird.f32 %v118_v7 }
  0xb5   : > { %v318_v8 = vpop.eup %317 }
  0xb6   : > { %v123_v9 = vmul.f32 %v318_v8, %v121_v6 }
  0xb8   : > { %124 = vst [vmem:[#allocation2] sm:$0xff] %v123_v9 }
  0xbf   : > { %v137_v13 = vld [vmem:[#allocation2 + $0x3] ss:$0 sm:$0xff]  ;;  %v147_v16 = vld [vmem:[#allocation2 + $0x2] ss:$0 sm:$0xff]  ;;  %v157_v21 = vld [vmem:[#allocation2 + $0x1] ss:$0 sm:$0xff] }
  0xc0   : > { %v138_v14 = vxor.u32 2147483648, %v137_v13  ;;  %v148_v18 = vxor.u32 2147483648, %v147_v16  ;;  %v158_v23 = vxor.u32 2147483648, %v157_v21  ;;  %v166_v26 = vld [vmem:[#allocation2] ss:$0 sm:$0xff] }
  0xc1   : > { %v167_v28 = vxor.u32 2147483648, %v166_v26 }
  0xc2   : > { %v142_v15 = vmul.f32 %v138_v14, %v135_v12 }
  0xc4   : > { %143 = vadd.xlane.f32.xlu0 %v142_v15 }
 0x151   : > { %v144_v17 = vpop.xlane.xlu0 %143 }
 0x152   : > { %v145_v19 = vsel %vm141_vm6, %v144_v17, %v135_v12 }
 0x153   : > { %v152_v20 = vmul.f32 %v148_v18, %v145_v19 }
 0x155   : > { %153 = vadd.xlane.f32.xlu1 %v152_v20 }
 0x1e2   : > { %v154_v22 = vpop.xlane.xlu1 %153 }
 0x1e3   : > { %v155_v24 = vsel %vm151_vm7, %v154_v22, %v145_v19 }
 0x1e4   : > { %v162_v25 = vmul.f32 %v158_v23, %v155_v24 }
 0x1e6   : > { %163 = vadd.xlane.f32.xlu1 %v162_v25 }
 0x273   : > { %v164_v27 = vpop.xlane.xlu1 %163 }
 0x274   : > { %v165_v29 = vsel %vm161_vm8, %v164_v27, %v155_v24 }
 0x275   : > { %v171_v30 = vmul.f32 %v167_v28, %v165_v29 }
 0x277   : > { %172 = vadd.xlane.f32.xlu0 %v171_v30 }
 0x304   : > { %v173_v31 = vpop.xlane.xlu0 %172 }
 0x305   : > { %v174_v32 = vsel %vm170_vm9, %v173_v31, %v165_v29 }
 0x306   : > { %v176_v33 = vmul.f32 %v318_v8, %v174_v32 }
 0x308   : > { %v178_v34 = vsel %vm177_vm10, %v174_v32, %v176_v33 }
 0x309   : > { %217 = vst [vmem:[%s188_s24] sm:$0xff] %v178_v34 }
 0x30a PF: > { %s7_s8 = sadd.s32 1, %s341_s8   ;;  %s396_s6 = smov %s337_s7 }
 0x30b   : > { %p4_p5 = scmp.ge.s32.totalorder %s7_s8, 10   ;;  %s397_s7 = smov %s399_s10 }
 0x30d   :  { %6 = sbr.rel (!%p4_p5) target bundleno = 2 (0x2), region = 121 }

// kernel: lm_mle_forward.6
= control target key start
LH: loop header
LB: loop body
LE: loop exit
PB: predicated region body
PF: predicated region fallthrough
CT: control target
= control target key end

     0   :  { %v2157_v0 = vmov 0   ;;  %v2158_v2 = vmov 2   ;;  %v2159_v5 = vmov 1   ;;  %v2160_v9 = vmov 4   ;;  %s3403_s4 = inlined_call_operand.vmem [shape: f32[8,5], index: 4, kind: input, shape index: {}]   ;;  %s3404_s0 = inlined_call_operand.vmem [shape: f32[2688,128], index: 0, kind: input, shape index: {}]   ;;  %s3405_s1 = inlined_call_operand.vmem [shape: f32[1,256], index: 1, kind: input, shape index: {}]   ;;  %s3406_s2 = inlined_call_operand.vmem [shape: f32[1,256], index: 2, kind: input, shape index: {}]   ;;  %s3407_s6 = inlined_call_operand.vmem [shape: f32[8,256], index: 6, kind: output, shape index: {1}]   ;;  %s3408_s3 = inlined_call_operand.vmem [shape: f32[8,256], index: 3, kind: input, shape index: {}]   ;;  %s3409_s5 = inlined_call_operand.vmem [shape: f32[8,128], index: 5, kind: output, shape index: {0}]  }
   0x1   :  { %2134 = vset.pattern.permute.xlu0 %v2157_v0  ;;  %v24_v1 = vld [vmem:[%s3403_s4] sm:$0xff]  ;;  %2136 = vset.pattern.permute.xlu1 %v2158_v2  ;;  %v2161_v14 = vmov 3   ;;  %v280_v17 = vld [vmem:[%s3404_s0 + $0x88] sm:$0xff]  ;;  %v281_v28 = vld [vmem:[%s3404_s0 + $0x90] sm:$0xff]  ;;  %vm2164_vm4 = vmmov 0  }
   0x2   :  { %47 = vperm.xlu0 %2134, %v24_v1   ;;  %v27_v3 = vmul.f32 0.5, %v24_v1  ;;  %v110_v12 = vmul.f32 1.3, %v24_v1  ;;  %v279_v16 = vld [vmem:[%s3404_s0 + $0x80] sm:$0xff]  ;;  %v312_v20 = vld [vmem:[%s3404_s0 + $0x188] sm:$0xff]  ;;  %v282_v29 = vld [vmem:[%s3404_s0 + $0x98] sm:$0xff] }
   0x3   :  { %v311_v18 = vld [vmem:[%s3404_s0 + $0x180] sm:$0xff]  ;;  %v1782_v19 = vpack.c.bf16 %v280_v17, %v279_v16  ;;  %v264_v22 = vld [vmem:[%s3404_s0 + $0x8] sm:$0xff]  ;;  %v313_v30 = vld [vmem:[%s3404_s0 + $0x190] sm:$0xff]  ;;  %v1786_v31 = vpack.c.bf16 %v282_v29, %v281_v28 }
   0x4   :  { %v28_v4 = vmul.f32 %v27_v3, %v24_v1  ;;  %v263_v21 = vld [vmem:[%s3404_s0] sm:$0xff]  ;;  %v1814_v23 = vpack.c.bf16 %v312_v20, %v311_v18  ;;  %v296_v26 = vld [vmem:[%s3404_s0 + $0x108] sm:$0xff]  ;;  %v314_v32 = vld [vmem:[%s3404_s0 + $0x198] sm:$0xff] }
   0x5   :  { %v1784_v24 = vpack.c.bf16 %v264_v22, %v263_v21  ;;  %v295_v25 = vld [vmem:[%s3404_s0 + $0x100] sm:$0xff]  ;;  %1783 = vmatprep.subr.bf16.mxu0 %v1782_v19  ;;  %v265_v33 = vld [vmem:[%s3404_s0 + $0x10] sm:$0xff]  ;;  %v266_v34 = vld [vmem:[%s3404_s0 + $0x18] sm:$0xff]  ;;  %v1818_v35 = vpack.c.bf16 %v314_v32, %v313_v30 }
   0x6   :  { %2135 = vset.pattern.permute.xlu0 %v2159_v5  ;;  %v29_v6 = vadd.f32 1.0, %v28_v4  ;;  %v1816_v27 = vpack.c.bf16 %v296_v26, %v295_v25  ;;  %1815 = vmatprep.subr.bf16.mxu1 %v1814_v23  ;;  %v1788_v36 = vpack.c.bf16 %v266_v34, %v265_v33  ;;  %v297_v37 = vld [vmem:[%s3404_s0 + $0x110] sm:$0xff]  ;;  %v298_v38 = vld [vmem:[%s3404_s0 + $0x118] sm:$0xff]  ;;  %v283_v40 = vld [vmem:[%s3404_s0 + $0xa0] sm:$0xff] }
   0x7   :  { %64 = vperm.xlu0 %2135, %v24_v1   ;;  %1785 = vmatpush3.bf16.msra.mxu0 %v1784_v24  ;;  %v1820_v39 = vpack.c.bf16 %v298_v38, %v297_v37  ;;  %v284_v41 = vld [vmem:[%s3404_s0 + $0xa8] sm:$0xff]  ;;  %v315_v42 = vld [vmem:[%s3404_s0 + $0x1a0] sm:$0xff]  ;;  %v285_v52 = vld [vmem:[%s3404_s0 + $0xb0] sm:$0xff] }
   0x8   :  { %v30_v7 = vmul.f32 1.3, %v29_v6  ;;  %1817 = vmatpush3.bf16.msra.mxu1 %v1816_v27  ;;  %1787 = vmatprep.subr.bf16.mxu0 %v1786_v31  ;;  %v1790_v43 = vpack.c.bf16 %v284_v41, %v283_v40  ;;  %v316_v44 = vld [vmem:[%s3404_s0 + $0x1a8] sm:$0xff]  ;;  %v267_v45 = vld [vmem:[%s3404_s0 + $0x20] sm:$0xff]  ;;  %v286_v53 = vld [vmem:[%s3404_s0 + $0xb8] sm:$0xff] }
   0x9   :  { %1819 = vmatprep.subr.bf16.mxu1 %v1818_v35  ;;  %v268_v46 = vld [vmem:[%s3404_s0 + $0x28] sm:$0xff]  ;;  %v1822_v47 = vpack.c.bf16 %v316_v44, %v315_v42  ;;  %v299_v49 = vld [vmem:[%s3404_s0 + $0x120] sm:$0xff]  ;;  %v317_v54 = vld [vmem:[%s3404_s0 + $0x1b0] sm:$0xff]  ;;  %v1794_v55 = vpack.c.bf16 %v286_v53, %v285_v52 }
   0xa   :  { %v31_v8 = vmul.f32 %v30_v7, %v30_v7  ;;  %v1792_v48 = vpack.c.bf16 %v268_v46, %v267_v45  ;;  %v300_v50 = vld [vmem:[%s3404_s0 + $0x128] sm:$0xff]  ;;  %v318_v56 = vld [vmem:[%s3404_s0 + $0x1b8] sm:$0xff]  ;;  %v269_v57 = vld [vmem:[%s3404_s0 + $0x30] sm:$0xff] }
   0xb   :  { %2138 = vset.pattern.permute.xlu0 %v2160_v9  ;;  %1789 = vmatpush3.bf16.msra.mxu0 %v1788_v36  ;;  %v1824_v51 = vpack.c.bf16 %v300_v50, %v299_v49  ;;  %v270_v58 = vld [vmem:[%s3404_s0 + $0x38] sm:$0xff]  ;;  %v1826_v59 = vpack.c.bf16 %v318_v56, %v317_v54  ;;  %v301_v61 = vld [vmem:[%s3404_s0 + $0x130] sm:$0xff]  ;;  %v287_v0 = vld [vmem:[%s3404_s0 + $0xc0] sm:$0xff]  ;;  %v35_v54 = vlaneseq }
   0xc   :  { %2141 = vrcp.f32 %v31_v8  ;;  %103 = vperm.xlu0 %2138, %v24_v1   ;;  %1821 = vmatpush3.bf16.msra.mxu1 %v1820_v39  ;;  %v1796_v60 = vpack.c.bf16 %v270_v58, %v269_v57  ;;  %v302_v62 = vld [vmem:[%s3404_s0 + $0x138] sm:$0xff]  ;;  %v320_v4 = vld [vmem:[%s3404_s0 + $0x1c8] sm:$0xff]  ;;  %v271_v5 = vld [vmem:[%s3404_s0 + $0x40] sm:$0xff] }
   0xd   :  { %2143 = vrcp.f32 %v30_v7  ;;  %1791 = vmatprep.subr.bf16.mxu0 %v1790_v43  ;;  %1823 = vmatprep.subr.bf16.mxu1 %v1822_v47  ;;  %v1828_v63 = vpack.c.bf16 %v302_v62, %v301_v61  ;;  %v272_v6 = vld [vmem:[%s3404_s0 + $0x48] sm:$0xff]  ;;  %v303_v9 = vld [vmem:[%s3404_s0 + $0x140] sm:$0xff]  ;;  %v322_v16 = vld [vmem:[%s3404_s0 + $0x1d8] sm:$0xff] }
   0xe   :  { %v1800_v8 = vpack.c.bf16 %v272_v6, %v271_v5  ;;  %v273_v17 = vld [vmem:[%s3404_s0 + $0x50] sm:$0xff]  ;;  %v274_v18 = vld [vmem:[%s3404_s0 + $0x58] sm:$0xff]  ;;  %v291_v24 = vld [vmem:[%s3404_s0 + $0xe0] sm:$0xff] }
   0xf   :  { %1793 = vmatpush3.bf16.msra.mxu0 %v1792_v48  ;;  %v1804_v20 = vpack.c.bf16 %v274_v18, %v273_v17  ;;  %v305_v21 = vld [vmem:[%s3404_s0 + $0x150] sm:$0xff]  ;;  %v306_v22 = vld [vmem:[%s3404_s0 + $0x158] sm:$0xff]  ;;  %v292_v25 = vld [vmem:[%s3404_s0 + $0xe8] sm:$0xff] }
  0x10   :  { %2140 = vset.pattern.permute.xlu0 %v2158_v2  ;;  %1825 = vmatpush3.bf16.msra.mxu1 %v1824_v51  ;;  %v1836_v23 = vpack.c.bf16 %v306_v22, %v305_v21  ;;  %v323_v26 = vld [vmem:[%s3404_s0 + $0x1e0] sm:$0xff]  ;;  %v1806_v27 = vpack.c.bf16 %v292_v25, %v291_v24  ;;  %v324_v28 = vld [vmem:[%s3404_s0 + $0x1e8] sm:$0xff]  ;;  %v293_v36 = vld [vmem:[%s3404_s0 + $0xf0] sm:$0xff] }
  0x11   :  { %1795 = vmatprep.subr.bf16.mxu0 %v1794_v55  ;;  %1827 = vmatprep.subr.bf16.mxu1 %v1826_v59  ;;  %v275_v29 = vld [vmem:[%s3404_s0 + $0x60] sm:$0xff]  ;;  %v276_v30 = vld [vmem:[%s3404_s0 + $0x68] sm:$0xff]  ;;  %v1838_v31 = vpack.c.bf16 %v324_v28, %v323_v26  ;;  %v294_v37 = vld [vmem:[%s3404_s0 + $0xf8] sm:$0xff]  ;;  %v36_v55 = vshrl.u32 %v35_v54, 7 }
  0x12   :  { %v1808_v32 = vpack.c.bf16 %v276_v30, %v275_v29  ;;  %v307_v33 = vld [vmem:[%s3404_s0 + $0x160] sm:$0xff]  ;;  %v308_v34 = vld [vmem:[%s3404_s0 + $0x168] sm:$0xff]  ;;  %v325_v38 = vld [vmem:[%s3404_s0 + $0x1f0] sm:$0xff]  ;;  %v1810_v39 = vpack.c.bf16 %v294_v37, %v293_v36  ;;  %v2162_v30 = vmov 0.0  }
  0x13   :  { %1797 = vmatpush3.bf16.msra.mxu0 %v1796_v60  ;;  %v1840_v35 = vpack.c.bf16 %v308_v34, %v307_v33  ;;  %v326_v40 = vld [vmem:[%s3404_s0 + $0x1f8] sm:$0xff]  ;;  %v277_v41 = vld [vmem:[%s3404_s0 + $0x70] sm:$0xff]  ;;  %v343_v48 = vld [vmem:[%s3404_s0 + $0x280] sm:$0xff]  ;;  %v37_v57 = vsub.s32 0, %v36_v55  ;;  %v41_v58 = vsub.s32 1, %v36_v55 }
  0x14   :  { %1829 = vmatpush3.bf16.msra.mxu1 %v1828_v63  ;;  %v278_v42 = vld [vmem:[%s3404_s0 + $0x78] sm:$0xff]  ;;  %v1842_v43 = vpack.c.bf16 %v326_v40, %v325_v38  ;;  %v309_v45 = vld [vmem:[%s3404_s0 + $0x170] sm:$0xff]  ;;  %v344_v49 = vld [vmem:[%s3404_s0 + $0x288] sm:$0xff] }
  0x15   :  { %v1812_v44 = vpack.c.bf16 %v278_v42, %v277_v41  ;;  %v310_v46 = vld [vmem:[%s3404_s0 + $0x178] sm:$0xff]  ;;  %v375_v50 = vld [vmem:[%s3404_s0 + $0x380] sm:$0xff]  ;;  %v1846_v51 = vpack.c.bf16 %v344_v49, %v343_v48  ;;  %v376_v52 = vld [vmem:[%s3404_s0 + $0x388] sm:$0xff] }
  0x16   :  { %v2142_v10 = vpop.eup %2141  ;;  %v1844_v47 = vpack.c.bf16 %v310_v46, %v309_v45  ;;  %v1878_v53 = vpack.c.bf16 %v376_v52, %v375_v50  ;;  %v25_v59 = vld [vmem:[%s3405_s1] sm:$0x3]  ;;  %v23_v50 = vld [vmem:[%s3408_s3 + $0x8] sm:$0xff] }
  0x17   :  { %77 = vperm.xlu1 %2136, %v2142_v10   ;;  %v88_v11 = vmul.f32 0.15915494, %v2142_v10  ;;  %v2144_v13 = vpop.eup %2143  ;;  %v304_v10 = vld [vmem:[%s3404_s0 + $0x148] sm:$0xff]  ;;  %v26_v60 = vld [vmem:[%s3406_s2] sm:$0x3]  ;;  %v38_v61 = vrot.slane %v25_v59, %v37_v57  ;;  %v42_v62 = vrot.slane %v25_v59, %v41_v58 }
  0x18   :  { %v112_v15 = vmul.f32 %v2144_v13, %v110_v12  ;;  %v289_v12 = vld [vmem:[%s3404_s0 + $0xd0] sm:$0xff]  ;;  %v290_v13 = vld [vmem:[%s3404_s0 + $0xd8] sm:$0xff]  ;;  %v56_v63 = vrot.slane %v26_v60, %v37_v57  ;;  %v22_v45 = vld [vmem:[%s3408_s3] sm:$0xff] }
  0x1b   :  { %91 = vperm.xlu1 %2136, %v88_v11   ;;  %v1832_v11 = vpack.c.bf16 %v304_v10, %v303_v9 }
  0x1f   :  { %2137 = vset.pattern.permute.xlu1 %v2161_v14  ;;  %v321_v14 = vld [vmem:[%s3404_s0 + $0x1d0] sm:$0xff] }
  0x20   :  { %97 = vperm.xlu1 %2137, %v24_v1   ;;  %v288_v1 = vld [vmem:[%s3404_s0 + $0xc8] sm:$0xff]  ;;  %v1834_v19 = vpack.c.bf16 %v322_v16, %v321_v14 }
  0x21   :  { %v1798_v3 = vpack.c.bf16 %v288_v1, %v287_v0  ;;  %v60_v0 = vrot.slane %v26_v60, %v41_v58 }
  0x23   :  { %1799 = vmatprep.subr.bf16.mxu0 %v1798_v3 }
  0x24   :  { %2139 = vset.pattern.permute.xlu1 %v2158_v2  ;;  %v319_v2 = vld [vmem:[%s3404_s0 + $0x1c0] sm:$0xff]  ;;  %1801 = vmatpush3.bf16.msra.mxu0 %v1800_v8 }
  0x25   :  { %125 = vperm.xlu1 %2139, %v112_v15   ;;  %v1830_v7 = vpack.c.bf16 %v320_v4, %v319_v2  ;;  %v1802_v15 = vpack.c.bf16 %v290_v13, %v289_v12 }
  0x27   :  { %1831 = vmatprep.subr.bf16.mxu1 %v1830_v7  ;;  %1803 = vmatprep.subr.bf16.mxu0 %v1802_v15 }
  0x28   :  { %1833 = vmatpush3.bf16.msra.mxu1 %v1832_v11  ;;  %1805 = vmatpush3.bf16.msra.mxu0 %v1804_v20 }
  0x29   :  { %1835 = vmatprep.subr.bf16.mxu1 %v1834_v19  ;;  %1807 = vmatprep.subr.bf16.mxu0 %v1806_v27 }
  0x2c   :  { %1837 = vmatpush3.bf16.msra.mxu1 %v1836_v23  ;;  %1809 = vmatpush3.bf16.msra.mxu0 %v1808_v32 }
  0x2d   :  { %1839 = vmatprep.subr.bf16.mxu1 %v1838_v31  ;;  %1811 = vmatprep.subr.bf16.mxu0 %v1810_v39 }
  0x30   :  { %1841 = vmatpush3.bf16.msra.mxu1 %v1840_v35  ;;  %1813 = vmatpush3.bf16.msra.mxu0 %v1812_v44 }
  0x31   :  { %1843 = vmatprep.subr.bf16.mxu1 %v1842_v43  ;;  %1847 = vmatprep.subr.bf16.mxu0 %v1846_v51 }
  0x34   :  { %1845 = vmatpush3.bf16.msra.mxu1 %v1844_v47 }
  0x35   :  { %1879 = vmatprep.subr.bf16.mxu1 %v1878_v53 }
  0x81   :  { %v48_v56 = vpop.permute.xlu0 %47 }
  0x82   :  { %v50_v2 = vsub.f32 %v38_v61, %v48_v56  ;;  %v2413_v3 = vsub.f32 %v42_v62, %v48_v56 }
  0x84   :  { %v69_v6 = vmul.f32 %v50_v2, %v50_v2  ;;  %v70_v7 = vmul.f32 %v2413_v3, %v2413_v3 }
  0x86   :  { %v65_v1 = vpop.permute.xlu0 %64 }
  0x87   :  { %v67_v4 = vsub.f32 %v56_v63, %v65_v1  ;;  %v68_v5 = vsub.f32 %v60_v0, %v65_v1 }
  0x89   :  { %v71_v8 = vmul.f32 %v67_v4, %v67_v4  ;;  %v72_v9 = vmul.f32 %v68_v5, %v68_v5 }
  0x8b   :  { %v73_v10 = vadd.f32 %v71_v8, %v69_v6  ;;  %v74_v11 = vadd.f32 %v72_v9, %v70_v7  ;;  %v104_v25 = vpop.permute.xlu0 %103  ;;  %v327_v6 = vld [vmem:[%s3404_s0 + $0x200] sm:$0xff]  ;;  %v328_v7 = vld [vmem:[%s3404_s0 + $0x208] sm:$0xff] }
  0x8c   :  { %v359_v8 = vld [vmem:[%s3404_s0 + $0x300] sm:$0xff] }
  0x96   :  { %v2417_v12 = vpop.permute.xlu1 %77 }
  0x97   :  { %v80_v13 = vmul.f32 %v2417_v12, %v73_v10  ;;  %v81_v14 = vmul.f32 %v2417_v12, %v74_v11 }
  0x99   :  { %v82_v15 = vmul.f32 -0.5, %v80_v13  ;;  %v83_v16 = vmul.f32 -0.5, %v81_v14  ;;  %v1378_v37 = vadd.f32 -2.0, %v80_v13  ;;  %v1379_v38 = vadd.f32 -2.0, %v81_v14  ;;  %v360_v13 = vld [vmem:[%s3404_s0 + $0x308] sm:$0xff]  ;;  %v345_v14 = vld [vmem:[%s3404_s0 + $0x290] sm:$0xff] }
  0x9a   :  { %v92_v19 = vpop.permute.xlu1 %91 }
  0x9b   :  { %v84_v17 = vmul.f32 1.442695, %v82_v15  ;;  %v86_v18 = vmul.f32 1.442695, %v83_v16  ;;  %v346_v15 = vld [vmem:[%s3404_s0 + $0x298] sm:$0xff] }
  0x9d   :  { %2145 = vpow2.f32 %v84_v17 }
  0x9e   :  { %2147 = vpow2.f32 %v86_v18 }
  0x9f   :  { %v98_v24 = vpop.permute.xlu1 %97 }
  0xa4   :  { %v126_v35 = vpop.permute.xlu1 %125 }
  0xa5   :  { %v128_v43 = vmul.f32 %v1378_v37, %v126_v35  ;;  %v129_v44 = vmul.f32 %v1379_v38, %v126_v35  ;;  %v1850_v35 = vpack.c.bf16 %v346_v15, %v345_v14  ;;  %v347_v37 = vld [vmem:[%s3404_s0 + $0x2a0] sm:$0xff]  ;;  %v348_v38 = vld [vmem:[%s3404_s0 + $0x2a8] sm:$0xff] }
  0xa7   :  { %v2146_v20 = vpop.eup %2145 }
  0xa8   :  { %v2148_v21 = vpop.eup %2147  ;;  %v2421_v22 = vmul.f32 %v2146_v20, %v92_v19  ;;  %v377_v20 = vld [vmem:[%s3404_s0 + $0x390] sm:$0xff] }
  0xa9   :  { %v2423_v23 = vmul.f32 %v2148_v21, %v92_v19  ;;  %v378_v21 = vld [vmem:[%s3404_s0 + $0x398] sm:$0xff] }
  0xaa   :  { %v100_v26 = vmul.f32 %v98_v24, %v2421_v22 }
  0xab   :  { %v101_v27 = vmul.f32 %v98_v24, %v2423_v23 }
  0xac   :  { %v106_v28 = vadd.f32 %v104_v25, %v100_v26  ;;  %v117_v40 = vmul.f32 %v100_v26, %v67_v4  ;;  %v113_v47 = vmul.f32 %v100_v26, %v50_v2  ;;  %v2452_v54 = vmul.f32 %v128_v43, %v100_v26  ;;  %v379_v43 = vld [vmem:[%s3404_s0 + $0x3a0] sm:$0xff] }
  0xad   :  { %v107_v29 = vadd.f32 %v104_v25, %v101_v27  ;;  %v118_v49 = vmul.f32 %v101_v27, %v68_v5  ;;  %v114_v52 = vmul.f32 %v101_v27, %v2413_v3  ;;  %v2454_v55 = vmul.f32 %v129_v44, %v101_v27  ;;  %v380_v44 = vld [vmem:[%s3404_s0 + $0x3a8] sm:$0xff] }
  0xae   :  { %108 = vst [vmem:[%s3407_s6] sm:$0xff] %v106_v28  ;;  %vm132_vm0 = vcmp.gt.f32.partialorder %v106_v28, 0.0  ;;  %vm134_vm1 = vcmp.lt.f32.partialorder %v106_v28, 0.0  ;;  %v2457_v58 = vmul.f32 %v117_v40, %v2417_v12  ;;  %v2462_v0 = vmul.f32 %v113_v47, %v2417_v12 }
  0xaf   :  { %109 = vst [vmem:[%s3407_s6 + $0x8] sm:$0xff] %v107_v29  ;;  %vm133_vm2 = vcmp.gt.f32.partialorder %v107_v29, 0.0  ;;  %vm135_vm3 = vcmp.lt.f32.partialorder %v107_v29, 0.0  ;;  %v136_v31 = vsel %vm134_vm1, 2.220446e-13, %v2162_v30  ;;  %v2465_v2 = vmul.f32 %v118_v49, %v2417_v12  ;;  %v331_v49 = vld [vmem:[%s3404_s0 + $0x220] sm:$0xff] }
  0xb0   :  { %v137_v32 = vsel %vm135_vm3, 2.220446e-13, %v2162_v30  ;;  %v2435_v33 = vsel %vm132_vm0, %v106_v28, %v136_v31  ;;  %v2468_v4 = vmul.f32 %v114_v52, %v2417_v12  ;;  %v1848_v27 = vpack.c.bf16 %v328_v7, %v327_v6  ;;  %v329_v28 = vld [vmem:[%s3404_s0 + $0x210] sm:$0xff]  ;;  %v382_v7 = vld [vmem:[%s3404_s0 + $0x3b8] sm:$0xff] }
  0xb1   :  { %v2437_v34 = vsel %vm133_vm2, %v107_v29, %v137_v32  ;;  %2149 = vrcp.f32 %v2435_v33  ;;  %v154_v60 = vsub.f32 %v22_v45, %v2435_v33  ;;  %v330_v29 = vld [vmem:[%s3404_s0 + $0x218] sm:$0xff]  ;;  %v361_v31 = vld [vmem:[%s3404_s0 + $0x310] sm:$0xff] }
  0xb2   :  { %2151 = vrcp.f32 %v2437_v34  ;;  %v155_v63 = vsub.f32 %v23_v50, %v2437_v34  ;;  %v381_v6 = vld [vmem:[%s3404_s0 + $0x3b0] sm:$0xff] }
  0xb3   :  { %2153 = vlog2.f32 %v2435_v33 }
  0xb4   :  { %2155 = vlog2.f32 %v2437_v34 }
  0xbb   :  { %v2150_v36 = vpop.eup %2149 }
  0xbc   :  { %v2152_v39 = vpop.eup %2151  ;;  %v142_v41 = vmul.f32 %v2150_v36, %v2435_v33 }
  0xbd   :  { %v2154_v42 = vpop.eup %2153  ;;  %v143_v46 = vmul.f32 %v2152_v39, %v2437_v34 }
  0xbe   :  { %v2156_v48 = vpop.eup %2155  ;;  %v144_v51 = vsub.f32 2.0, %v142_v41  ;;  %v149_v53 = vmul.f32 0.6931472, %v2154_v42  ;;  %v1882_v42 = vpack.c.bf16 %v378_v21, %v377_v20  ;;  %v333_v21 = vld [vmem:[%s3404_s0 + $0x230] sm:$0xff] }
  0xbf   :  { %v145_v56 = vsub.f32 2.0, %v143_v46  ;;  %v151_v57 = vmul.f32 0.6931472, %v2156_v48  ;;  %v1852_v48 = vpack.c.bf16 %v330_v29, %v329_v28 }
  0xc0   :  { %v146_v59 = vmul.f32 %v2150_v36, %v144_v51  ;;  %v160_v61 = vmul.f32 %v149_v53, %v22_v45  ;;  %v362_v36 = vld [vmem:[%s3404_s0 + $0x318] sm:$0xff]  ;;  %v363_v51 = vld [vmem:[%s3404_s0 + $0x320] sm:$0xff] }
  0xc1   :  { %v147_v62 = vmul.f32 %v2152_v39, %v145_v56  ;;  %v161_v1 = vmul.f32 %v151_v57, %v23_v50  ;;  %v1884_v53 = vpack.c.bf16 %v362_v36, %v361_v31  ;;  %v1854_v56 = vpack.c.bf16 %v348_v38, %v347_v37  ;;  %v364_v57 = vld [vmem:[%s3404_s0 + $0x328] sm:$0xff]  ;;  %v366_v31 = vld [vmem:[%s3404_s0 + $0x338] sm:$0xff]  ;;  %v383_v38 = vld [vmem:[%s3404_s0 + $0x3c0] sm:$0xff] }
  0xc2   :  { %v152_v3 = vmul.f32 %v146_v59, %v22_v45  ;;  %v2470_v5 = vmul.f32 %v154_v60, %v146_v59  ;;  %v162_v11 = vsub.f32 %v160_v61, %v2435_v33  ;;  %v350_v60 = vld [vmem:[%s3404_s0 + $0x2b8] sm:$0xff] }
  0xc3   :  { %v153_v9 = vmul.f32 %v147_v62, %v23_v50  ;;  %v2481_v10 = vmul.f32 %v155_v63, %v147_v62  ;;  %v163_v12 = vsub.f32 %v161_v1, %v2437_v34  ;;  %v1880_v34 = vpack.c.bf16 %v360_v13, %v359_v8  ;;  %v332_v50 = vld [vmem:[%s3404_s0 + $0x228] sm:$0xff] }
  0xc4   :  { %v2494_v16 = vmul.f32 %v152_v3, %v146_v59  ;;  %v164_v17 = vmul.f32 %v2470_v5, %v2462_v0  ;;  %v168_v18 = vmul.f32 %v2470_v5, %v2452_v54  ;;  %v166_v19 = vmul.f32 %v2470_v5, %v2457_v58  ;;  %v349_v59 = vld [vmem:[%s3404_s0 + $0x2b0] sm:$0xff] }
  0xc5   :  { %v2508_v24 = vmul.f32 %v153_v9, %v147_v62  ;;  %v165_v25 = vmul.f32 %v2481_v10, %v2468_v4  ;;  %v169_v26 = vmul.f32 %v2481_v10, %v2454_v55  ;;  %v167_v33 = vmul.f32 %v2481_v10, %v2465_v2 }
  0xc6   :  { %v2525_v32 = vmul.f32 %v2494_v16, %v2462_v0  ;;  %v200_v45 = vadd.f32 %v163_v12, %v162_v11  ;;  %v210_v61 = vadd.f32 %v2481_v10, %v2470_v5  ;;  %v2574_v62 = vmul.f32 %v2494_v16, %v2457_v58 }
  0xc7   :  { %v2540_v39 = vmul.f32 %v2508_v24, %v2468_v4  ;;  %v202_v40 = vadd.f32 %v165_v25, %v164_v17  ;;  %v206_v41 = vadd.f32 %v169_v26, %v168_v18  ;;  %v204_v46 = vadd.f32 %v167_v33, %v166_v19  ;;  %v334_v25 = vld [vmem:[%s3404_s0 + $0x238] sm:$0xff]  ;;  %v365_v26 = vld [vmem:[%s3404_s0 + $0x330] sm:$0xff]  ;;  %v351_v33 = vld [vmem:[%s3404_s0 + $0x2c0] sm:$0xff] }
  0xc8   :  { %v182_v47 = vmul.f32 %v2525_v32, %v2457_v58  ;;  %v2578_v63 = vmul.f32 %v2508_v24, %v2465_v2  ;;  %v1886_v3 = vpack.c.bf16 %v380_v44, %v379_v43  ;;  %v184_v8 = vmul.f32 %v2525_v32, %v2452_v54 }
  0xc9   :  { %663 = vmatprep.mubr.f32.mxu0 %v202_v40  ;;  %733 = vmatprep.mubr.f32.mxu1 %v206_v41  ;;  %v183_v52 = vmul.f32 %v2540_v39, %v2465_v2  ;;  %v1856_v9 = vpack.c.bf16 %v332_v50, %v331_v49  ;;  %v1888_v11 = vpack.c.bf16 %v364_v57, %v363_v51  ;;  %v384_v40 = vld [vmem:[%s3404_s0 + $0x3c8] sm:$0xff] }
  0xca   :  { %664 = vmatmul.mubr.f32.vlgmr.msra.gmra.mrb[0].mxu0 %v200_v45  ;;  %734 = vmatmul.mubr.f32.vlgmr.msra.gmra.mrb[0].mxu1 %v204_v46  ;;  %v1858_v12 = vpack.c.bf16 %v350_v60, %v349_v59  ;;  %v185_v13 = vmul.f32 %v2540_v39, %v2454_v55  ;;  %v2592_v14 = vadd.f32 %v2540_v39, %v2525_v32  ;;  %v336_v49 = vld [vmem:[%s3404_s0 + $0x248] sm:$0xff]  ;;  %v354_v60 = vld [vmem:[%s3404_s0 + $0x2d8] sm:$0xff] }
  0xcb   :  { %1849 = vmatpush3.bf16.msra.mxu0 %v1848_v27  ;;  %1881 = vmatpush3.bf16.msra.mxu1 %v1880_v34  ;;  %v214_v1 = vadd.f32 %v183_v52, %v182_v47  ;;  %v192_v15 = vmul.f32 %v2574_v62, %v2421_v22  ;;  %v1890_v17 = vpack.c.bf16 %v382_v7, %v381_v6  ;;  %v352_v34 = vld [vmem:[%s3404_s0 + $0x2c8] sm:$0xff]  ;;  %v367_v52 = vld [vmem:[%s3404_s0 + $0x340] sm:$0xff] }
  0xcc   :  { %803 = vmatprep.mubr.f32.mxu0 %v210_v61  ;;  %1851 = vmatprep.subr.bf16.mxu0 %v1850_v35  ;;  %v193_v18 = vmul.f32 %v2578_v63, %v2423_v23  ;;  %v176_v19 = vmul.f32 %v2494_v16, %v2452_v54  ;;  %v177_v20 = vmul.f32 %v2508_v24, %v2454_v55  ;;  %v385_v61 = vld [vmem:[%s3404_s0 + $0x3d0] sm:$0xff] }
  0xcd   :  { %1883 = vmatprep.subr.bf16.mxu1 %v1882_v42  ;;  %873 = vmatprep.mubr.f32.mxu1 %v214_v1  ;;  %v2611_v27 = vadd.f32 %v185_v13, %v184_v8  ;;  %v190_v28 = vmul.f32 %v2574_v62, %v2452_v54  ;;  %v191_v29 = vmul.f32 %v2578_v63, %v2454_v55  ;;  %v386_v1 = vld [vmem:[%s3404_s0 + $0x3d8] sm:$0xff] }
  0xce   :  { %v2626_v35 = vadd.f32 %v193_v18, %v192_v15  ;;  %v194_v36 = vmul.f32 %v176_v19, %v2452_v54  ;;  %v195_v37 = vmul.f32 %v177_v20, %v2454_v55  ;;  %v2640_v42 = vadd.f32 %v2578_v63, %v2574_v62  ;;  %v338_v13 = vld [vmem:[%s3404_s0 + $0x258] sm:$0xff] }
  0xcf   :  { %1853 = vmatpush3.bf16.msra.mxu0 %v1852_v48  ;;  %1885 = vmatpush3.bf16.msra.mxu1 %v1884_v53  ;;  %v2636_v41 = vadd.f32 %v191_v29, %v190_v28  ;;  %v2642_v43 = vadd.f32 %v177_v20, %v176_v19  ;;  %v178_v54 = vmul.f32 %v2494_v16, %v2421_v22  ;;  %v335_v48 = vld [vmem:[%s3404_s0 + $0x240] sm:$0xff]  ;;  %v368_v53 = vld [vmem:[%s3404_s0 + $0x348] sm:$0xff] }
  0xd0   :  { %1855 = vmatprep.subr.bf16.mxu0 %v1854_v56  ;;  %1887 = vmatprep.subr.bf16.mxu1 %v1886_v3  ;;  %v1860_v55 = vpack.c.bf16 %v334_v25, %v333_v21  ;;  %v2646_v44 = vadd.f32 %v195_v37, %v194_v36  ;;  %v179_v45 = vmul.f32 %v2508_v24, %v2423_v23  ;;  %v353_v56 = vld [vmem:[%s3404_s0 + $0x2d0] sm:$0xff]  ;;  %v387_v21 = vld [vmem:[%s3404_s0 + $0x3e0] sm:$0xff]  ;;  %v388_v25 = vld [vmem:[%s3404_s0 + $0x3e8] sm:$0xff] }
  0xd1   :  { %v1892_v46 = vpack.c.bf16 %v366_v31, %v365_v26  ;;  %v1862_v47 = vpack.c.bf16 %v352_v34, %v351_v33  ;;  %v198_v50 = vmul.f32 %v178_v54, %v2421_v22  ;;  %v1894_v51 = vpack.c.bf16 %v384_v40, %v383_v38  ;;  %v339_v29 = vld [vmem:[%s3404_s0 + $0x260] sm:$0xff]  ;;  %v340_v31 = vld [vmem:[%s3404_s0 + $0x268] sm:$0xff]  ;;  %v357_v38 = vld [vmem:[%s3404_s0 + $0x2f0] sm:$0xff] }
  0xd2   :  { %v199_v57 = vmul.f32 %v179_v45, %v2423_v23  ;;  %v2667_v59 = vadd.f32 %v179_v45, %v178_v54  ;;  %v196_v3 = vmul.f32 %v176_v19, %v2421_v22  ;;  %v197_v6 = vmul.f32 %v177_v20, %v2423_v23  ;;  %v355_v19 = vld [vmem:[%s3404_s0 + $0x2e0] sm:$0xff]  ;;  %v356_v20 = vld [vmem:[%s3404_s0 + $0x2e8] sm:$0xff]  ;;  %v358_v40 = vld [vmem:[%s3404_s0 + $0x2f8] sm:$0xff] }
  0xd3   :  { %1857 = vmatpush3.bf16.msra.mxu0 %v1856_v9  ;;  %1889 = vmatpush3.bf16.msra.mxu1 %v1888_v11  ;;  %v2684_v8 = vadd.f32 %v2508_v24, %v2494_v16  ;;  %v1864_v9 = vpack.c.bf16 %v336_v49, %v335_v48  ;;  %v1896_v11 = vpack.c.bf16 %v368_v53, %v367_v52  ;;  %v369_v16 = vld [vmem:[%s3404_s0 + $0x350] sm:$0xff]  ;;  %v370_v24 = vld [vmem:[%s3404_s0 + $0x358] sm:$0xff]  ;;  %v371_v36 = vld [vmem:[%s3404_s0 + $0x360] sm:$0xff] }
  0xd4   :  { %1859 = vmatprep.subr.bf16.mxu0 %v1858_v12  ;;  %1891 = vmatprep.subr.bf16.mxu1 %v1890_v17  ;;  %v2680_v7 = vadd.f32 %v199_v57, %v198_v50  ;;  %v337_v12 = vld [vmem:[%s3404_s0 + $0x250] sm:$0xff]  ;;  %v2692_v15 = vadd.f32 %v197_v6, %v196_v3  ;;  %v1866_v17 = vpack.c.bf16 %v354_v60, %v353_v56  ;;  %v372_v37 = vld [vmem:[%s3404_s0 + $0x368] sm:$0xff]  ;;  %v374_v50 = vld [vmem:[%s3404_s0 + $0x378] sm:$0xff] }
  0xd5   :  { %v1898_v18 = vpack.c.bf16 %v386_v1, %v385_v61  ;;  %v1868_v26 = vpack.c.bf16 %v338_v13, %v337_v12  ;;  %v1900_v28 = vpack.c.bf16 %v370_v24, %v369_v16  ;;  %v1870_v33 = vpack.c.bf16 %v356_v20, %v355_v19  ;;  %v389_v54 = vld [vmem:[%s3404_s0 + $0x3f0] sm:$0xff]  ;;  %v408_v56 = vld [vmem:[%s3404_s0 + $0x488] sm:$0xff]  ;;  %v439_v57 = vld [vmem:[%s3404_s0 + $0x580] sm:$0xff] }
  0xd6   :  { %v1902_v34 = vpack.c.bf16 %v388_v25, %v387_v21  ;;  %v341_v45 = vld [vmem:[%s3404_s0 + $0x270] sm:$0xff]  ;;  %v1904_v48 = vpack.c.bf16 %v372_v37, %v371_v36  ;;  %v1874_v52 = vpack.c.bf16 %v358_v40, %v357_v38  ;;  %v440_v60 = vld [vmem:[%s3404_s0 + $0x588] sm:$0xff]  ;;  %v170_v3 = vmul.f32 %v2470_v5, %v2421_v22  ;;  %v443_v36 = vld [vmem:[%s3404_s0 + $0x5a0] sm:$0xff] }
  0xd7   :  { %1861 = vmatpush3.bf16.msra.mxu0 %v1860_v55  ;;  %1893 = vmatpush3.bf16.msra.mxu1 %v1892_v46  ;;  %v390_v55 = vld [vmem:[%s3404_s0 + $0x3f8] sm:$0xff]  ;;  %v373_v49 = vld [vmem:[%s3404_s0 + $0x370] sm:$0xff]  ;;  %v180_v12 = vmul.f32 %v2525_v32, %v2462_v0  ;;  %v181_v13 = vmul.f32 %v2540_v39, %v2468_v4  ;;  %v392_v5 = vld [vmem:[%s3404_s0 + $0x408] sm:$0xff]  ;;  %v188_v24 = vmul.f32 %v2574_v62, %v2457_v58 }
  0xd8   :  { %1863 = vmatprep.subr.bf16.mxu0 %v1862_v47  ;;  %1895 = vmatprep.subr.bf16.mxu1 %v1894_v51  ;;  %v342_v46 = vld [vmem:[%s3404_s0 + $0x278] sm:$0xff]  ;;  %v1872_v47 = vpack.c.bf16 %v340_v31, %v339_v29  ;;  %v407_v51 = vld [vmem:[%s3404_s0 + $0x480] sm:$0xff]  ;;  %v1906_v53 = vpack.c.bf16 %v390_v55, %v389_v54  ;;  %v1908_v1 = vpack.c.bf16 %v374_v50, %v373_v49  ;;  %v424_v4 = vld [vmem:[%s3404_s0 + $0x508] sm:$0xff] }
  0xd9   :  { %v1876_v61 = vpack.c.bf16 %v342_v46, %v341_v45  ;;  %v1910_v6 = vpack.c.bf16 %v408_v56, %v407_v51  ;;  %v423_v0 = vld [vmem:[%s3404_s0 + $0x500] sm:$0xff]  ;;  %v409_v16 = vld [vmem:[%s3404_s0 + $0x490] sm:$0xff]  ;;  %v212_v58 = vadd.f32 %v181_v13, %v180_v12  ;;  %v426_v29 = vld [vmem:[%s3404_s0 + $0x518] sm:$0xff] }
  0xda   :  { %v393_v62 = vld [vmem:[%s3404_s0 + $0x410] sm:$0xff]  ;;  %v411_v31 = vld [vmem:[%s3404_s0 + $0x4a0] sm:$0xff]  ;;  %v444_v37 = vld [vmem:[%s3404_s0 + $0x5a8] sm:$0xff] }
  0xdb   :  { %1865 = vmatpush3.bf16.msra.mxu0 %v1864_v9  ;;  %1897 = vmatpush3.bf16.msra.mxu1 %v1896_v11  ;;  %v1942_v9 = vpack.c.bf16 %v440_v60, %v439_v57  ;;  %v171_v11 = vmul.f32 %v2481_v10, %v2423_v23  ;;  %v187_v10 = vmul.f32 %v2540_v39, %v2423_v23  ;;  %v410_v23 = vld [vmem:[%s3404_s0 + $0x498] sm:$0xff]  ;;  %v425_v21 = vld [vmem:[%s3404_s0 + $0x510] sm:$0xff]  ;;  %v395_v55 = vld [vmem:[%s3404_s0 + $0x420] sm:$0xff] }
  0xdc   :  { %1867 = vmatprep.subr.bf16.mxu0 %v1866_v17  ;;  %1899 = vmatprep.subr.bf16.mxu1 %v1898_v18  ;;  %v391_v17 = vld [vmem:[%s3404_s0 + $0x400] sm:$0xff]  ;;  %v186_v18 = vmul.f32 %v2525_v32, %v2421_v22  ;;  %v189_v22 = vmul.f32 %v2578_v63, %v2465_v2  ;;  %v441_v32 = vld [vmem:[%s3404_s0 + $0x590] sm:$0xff]  ;;  %v442_v39 = vld [vmem:[%s3404_s0 + $0x598] sm:$0xff]  ;;  %v1944_v2 = vpack.c.bf16 %v424_v4, %v423_v0 }
  0xdd   :  { %v1912_v19 = vpack.c.bf16 %v392_v5, %v391_v17  ;;  %v208_v20 = vadd.f32 %v171_v11, %v170_v3  ;;  %v394_v63 = vld [vmem:[%s3404_s0 + $0x418] sm:$0xff]  ;;  %v1948_v40 = vpack.c.bf16 %v426_v29, %v425_v21  ;;  %v396_v45 = vld [vmem:[%s3404_s0 + $0x428] sm:$0xff]  ;;  %v427_v46 = vld [vmem:[%s3404_s0 + $0x520] sm:$0xff] }
  0xde   :  { %v218_v25 = vadd.f32 %v187_v10, %v186_v18  ;;  %v1916_v38 = vpack.c.bf16 %v394_v63, %v393_v62  ;;  %v413_v49 = vld [vmem:[%s3404_s0 + $0x4b0] sm:$0xff]  ;;  %v414_v50 = vld [vmem:[%s3404_s0 + $0x4b8] sm:$0xff]  ;;  %v416_v11 = vld [vmem:[%s3404_s0 + $0x4c8] sm:$0xff] }
  0xdf   :  { %1869 = vmatpush3.bf16.msra.mxu0 %v1868_v26  ;;  %1901 = vmatpush3.bf16.msra.mxu1 %v1900_v28  ;;  %v1914_v26 = vpack.c.bf16 %v410_v23, %v409_v16  ;;  %v1946_v28 = vpack.c.bf16 %v442_v39, %v441_v32  ;;  %v445_v51 = vld [vmem:[%s3404_s0 + $0x5b0] sm:$0xff]  ;;  %v1922_v57 = vpack.c.bf16 %v414_v50, %v413_v49  ;;  %v447_v12 = vld [vmem:[%s3404_s0 + $0x5c0] sm:$0xff]  ;;  %v448_v13 = vld [vmem:[%s3404_s0 + $0x5c8] sm:$0xff] }
  0xe0   :  { %1871 = vmatprep.subr.bf16.mxu0 %v1870_v33  ;;  %1903 = vmatprep.subr.bf16.mxu1 %v1902_v34  ;;  %v412_v33 = vld [vmem:[%s3404_s0 + $0x4a8] sm:$0xff]  ;;  %v222_v34 = vadd.f32 %v189_v22, %v188_v24  ;;  %v397_v60 = vld [vmem:[%s3404_s0 + $0x430] sm:$0xff]  ;;  %v399_v10 = vld [vmem:[%s3404_s0 + $0x440] sm:$0xff]  ;;  %v1958_v16 = vpack.c.bf16 %v448_v13, %v447_v12 }
  0xe1   :  { %v1918_v54 = vpack.c.bf16 %v412_v33, %v411_v31  ;;  %v400_v0 = vld [vmem:[%s3404_s0 + $0x448] sm:$0xff]  ;;  %v431_v4 = vld [vmem:[%s3404_s0 + $0x540] sm:$0xff]  ;;  %v417_v22 = vld [vmem:[%s3404_s0 + $0x4d0] sm:$0xff] }
  0xe2   :  { %v432_v24 = vld [vmem:[%s3404_s0 + $0x548] sm:$0xff]  ;;  %v418_v23 = vld [vmem:[%s3404_s0 + $0x4d8] sm:$0xff]  ;;  %v449_v32 = vld [vmem:[%s3404_s0 + $0x5d0] sm:$0xff] }
  0xe3   :  { %1873 = vmatpush3.bf16.msra.mxu0 %v1872_v47  ;;  %1905 = vmatpush3.bf16.msra.mxu1 %v1904_v48  ;;  %v1950_v47 = vpack.c.bf16 %v444_v37, %v443_v36  ;;  %v428_v48 = vld [vmem:[%s3404_s0 + $0x528] sm:$0xff]  ;;  %v450_v39 = vld [vmem:[%s3404_s0 + $0x5d8] sm:$0xff]  ;;  %v433_v63 = vld [vmem:[%s3404_s0 + $0x550] sm:$0xff] }
  0xe4   :  { %1875 = vmatprep.subr.bf16.mxu0 %v1874_v52  ;;  %1907 = vmatprep.subr.bf16.mxu1 %v1906_v53  ;;  %v446_v52 = vld [vmem:[%s3404_s0 + $0x5b8] sm:$0xff]  ;;  %v1920_v53 = vpack.c.bf16 %v396_v45, %v395_v55  ;;  %v1952_v56 = vpack.c.bf16 %v428_v48, %v427_v46  ;;  %v1962_v21 = vpack.c.bf16 %v450_v39, %v449_v32  ;;  %v451_v29 = vld [vmem:[%s3404_s0 + $0x5e0] sm:$0xff]  ;;  %v452_v31 = vld [vmem:[%s3404_s0 + $0x5e8] sm:$0xff] }
  0xe5   :  { %v1954_v3 = vpack.c.bf16 %v446_v52, %v445_v51  ;;  %v402_v62 = vld [vmem:[%s3404_s0 + $0x458] sm:$0xff]  ;;  %v403_v37 = vld [vmem:[%s3404_s0 + $0x460] sm:$0xff]  ;;  %v436_v55 = vld [vmem:[%s3404_s0 + $0x568] sm:$0xff] }
  0xe6   :  { %v421_v45 = vld [vmem:[%s3404_s0 + $0x4f0] sm:$0xff]  ;;  %v422_v46 = vld [vmem:[%s3404_s0 + $0x4f8] sm:$0xff]  ;;  %v455_v13 = vld [vmem:[%s3404_s0 + $0x600] sm:$0xff] }
  0xe7   :  { %1877 = vmatpush3.bf16.msra.mxu0 %v1876_v61  ;;  %1909 = vmatpush3.bf16.msra.mxu1 %v1908_v1  ;;  %v398_v61 = vld [vmem:[%s3404_s0 + $0x438] sm:$0xff]  ;;  %v429_v1 = vld [vmem:[%s3404_s0 + $0x530] sm:$0xff]  ;;  %v1938_v51 = vpack.c.bf16 %v422_v46, %v421_v45 }
  0xe8   :  { %1911 = vmatprep.subr.bf16.mxu0 %v1910_v6  ;;  %1943 = vmatprep.subr.bf16.mxu1 %v1942_v9  ;;  %v430_v6 = vld [vmem:[%s3404_s0 + $0x538] sm:$0xff]  ;;  %v415_v9 = vld [vmem:[%s3404_s0 + $0x4c0] sm:$0xff]  ;;  %v1924_v17 = vpack.c.bf16 %v398_v61, %v397_v60  ;;  %v405_v52 = vld [vmem:[%s3404_s0 + $0x470] sm:$0xff] }
  0xe9   :  { %v1956_v5 = vpack.c.bf16 %v430_v6, %v429_v1  ;;  %v1926_v18 = vpack.c.bf16 %v416_v11, %v415_v9  ;;  %v454_v48 = vld [vmem:[%s3404_s0 + $0x5f8] sm:$0xff]  ;;  %v471_v61 = vld [vmem:[%s3404_s0 + $0x680] sm:$0xff]  ;;  %v472_v1 = vld [vmem:[%s3404_s0 + $0x688] sm:$0xff] }
  0xea   :  { %804 = vmatmul.mubr.f32.vlgmr.msra.gmra.mrb[2].mxu0 %v208_v20  ;;  %874 = vmatmul.mubr.f32.vlgmr.msra.gmra.mrb[2].mxu1 %v212_v58  ;;  %v1960_v20 = vpack.c.bf16 %v432_v24, %v431_v4  ;;  %v1930_v58 = vpack.c.bf16 %v418_v23, %v417_v22  ;;  %v438_v60 = vld [vmem:[%s3404_s0 + $0x578] sm:$0xff]  ;;  %v504_v6 = vld [vmem:[%s3404_s0 + $0x788] sm:$0xff]  ;;  %v1974_v12 = vpack.c.bf16 %v472_v1, %v471_v61  ;;  %v505_v24 = vld [vmem:[%s3404_s0 + $0x790] sm:$0xff] }
  0xeb   :  { %1913 = vmatpush3.bf16.msra.mxu0 %v1912_v19  ;;  %943 = vmatprep.mubr.f32.mxu0 %v218_v25  ;;  %v1928_v19 = vpack.c.bf16 %v400_v0, %v399_v10  ;;  %v434_v25 = vld [vmem:[%s3404_s0 + $0x558] sm:$0xff]  ;;  %v488_v10 = vld [vmem:[%s3404_s0 + $0x708] sm:$0xff]  ;;  %v473_v0 = vld [vmem:[%s3404_s0 + $0x690] sm:$0xff] }
  0xec   :  { %1945 = vmatpush3.bf16.msra.mxu1 %v1944_v2  ;;  %1013 = vmatprep.mubr.f32.mxu1 %v222_v34  ;;  %v401_v2 = vld [vmem:[%s3404_s0 + $0x450] sm:$0xff]  ;;  %v1964_v34 = vpack.c.bf16 %v434_v25, %v433_v63  ;;  %v474_v4 = vld [vmem:[%s3404_s0 + $0x698] sm:$0xff]  ;;  %v508_v25 = vld [vmem:[%s3404_s0 + $0x7a8] sm:$0xff] }
  0xed   :  { %1915 = vmatprep.subr.bf16.mxu0 %v1914_v26  ;;  %1947 = vmatprep.subr.bf16.mxu1 %v1946_v28  ;;  %v419_v26 = vld [vmem:[%s3404_s0 + $0x4e0] sm:$0xff]  ;;  %v420_v28 = vld [vmem:[%s3404_s0 + $0x4e8] sm:$0xff]  ;;  %v1932_v33 = vpack.c.bf16 %v402_v62, %v401_v2  ;;  %v506_v22 = vld [vmem:[%s3404_s0 + $0x798] sm:$0xff] }
  0xee   :  { %v1934_v36 = vpack.c.bf16 %v420_v28, %v419_v26  ;;  %v457_v32 = vld [vmem:[%s3404_s0 + $0x610] sm:$0xff]  ;;  %v458_v39 = vld [vmem:[%s3404_s0 + $0x618] sm:$0xff]  ;;  %v475_v2 = vld [vmem:[%s3404_s0 + $0x6a0] sm:$0xff]  ;;  %v2010_v63 = vpack.c.bf16 %v506_v22, %v505_v24 }
  0xef   :  { %1917 = vmatpush3.bf16.msra.mxu0 %v1916_v38  ;;  %v404_v38 = vld [vmem:[%s3404_s0 + $0x468] sm:$0xff]  ;;  %v1980_v26 = vpack.c.bf16 %v458_v39, %v457_v32  ;;  %v462_v45 = vld [vmem:[%s3404_s0 + $0x638] sm:$0xff]  ;;  %v493_v46 = vld [vmem:[%s3404_s0 + $0x730] sm:$0xff] }
  0xf0   :  { %1949 = vmatpush3.bf16.msra.mxu1 %v1948_v40  ;;  %1919 = vmatprep.subr.bf16.mxu0 %v1918_v54  ;;  %v435_v40 = vld [vmem:[%s3404_s0 + $0x560] sm:$0xff]  ;;  %v1966_v54 = vpack.c.bf16 %v452_v31, %v451_v29  ;;  %v1936_v49 = vpack.c.bf16 %v404_v38, %v403_v37  ;;  %v476_v62 = vld [vmem:[%s3404_s0 + $0x6a8] sm:$0xff]  ;;  %v509_v37 = vld [vmem:[%s3404_s0 + $0x7b0] sm:$0xff] }
  0xf1   :  { %1951 = vmatprep.subr.bf16.mxu1 %v1950_v47  ;;  %v453_v47 = vld [vmem:[%s3404_s0 + $0x5f0] sm:$0xff]  ;;  %v1968_v50 = vpack.c.bf16 %v436_v55, %v435_v40  ;;  %v1982_v29 = vpack.c.bf16 %v476_v62, %v475_v2  ;;  %v460_v31 = vld [vmem:[%s3404_s0 + $0x628] sm:$0xff]  ;;  %v495_v1 = vld [vmem:[%s3404_s0 + $0x740] sm:$0xff] }
  0xf2   :  { %v461_v55 = vld [vmem:[%s3404_s0 + $0x630] sm:$0xff]  ;;  %v464_v61 = vld [vmem:[%s3404_s0 + $0x648] sm:$0xff]  ;;  %v498_v24 = vld [vmem:[%s3404_s0 + $0x758] sm:$0xff] }
  0xf3   :  { %1921 = vmatpush3.bf16.msra.mxu0 %v1920_v53  ;;  %v406_v53 = vld [vmem:[%s3404_s0 + $0x478] sm:$0xff]  ;;  %v483_v22 = vld [vmem:[%s3404_s0 + $0x6e0] sm:$0xff]  ;;  %v516_v39 = vld [vmem:[%s3404_s0 + $0x7e8] sm:$0xff] }
  0xf4   :  { %1953 = vmatpush3.bf16.msra.mxu1 %v1952_v56  ;;  %1923 = vmatprep.subr.bf16.mxu0 %v1922_v57  ;;  %v437_v56 = vld [vmem:[%s3404_s0 + $0x570] sm:$0xff]  ;;  %v1970_v57 = vpack.c.bf16 %v454_v48, %v453_v47  ;;  %v1940_v9 = vpack.c.bf16 %v406_v53, %v405_v52  ;;  %v494_v48 = vld [vmem:[%s3404_s0 + $0x738] sm:$0xff]  ;;  %v512_v52 = vld [vmem:[%s3404_s0 + $0x7c8] sm:$0xff]  ;;  %v1988_v53 = vpack.c.bf16 %v462_v45, %v461_v55 }
  0xf5   :  { %1955 = vmatprep.subr.bf16.mxu1 %v1954_v3  ;;  %v503_v3 = vld [vmem:[%s3404_s0 + $0x780] sm:$0xff]  ;;  %v1972_v11 = vpack.c.bf16 %v438_v60, %v437_v56  ;;  %v2020_v56 = vpack.c.bf16 %v494_v48, %v493_v46  ;;  %v468_v62 = vld [vmem:[%s3404_s0 + $0x668] sm:$0xff] }
  0xf6   :  { %v463_v60 = vld [vmem:[%s3404_s0 + $0x640] sm:$0xff]  ;;  %v568_v55 = vld [vmem:[%s3404_s0 + $0x988] sm:$0xff] }
  0xf7   :  { %1925 = vmatpush3.bf16.msra.mxu0 %v1924_v17  ;;  %v456_v17 = vld [vmem:[%s3404_s0 + $0x608] sm:$0xff]  ;;  %v515_v32 = vld [vmem:[%s3404_s0 + $0x7e0] sm:$0xff] }
  0xf8   :  { %1957 = vmatpush3.bf16.msra.mxu1 %v1956_v5  ;;  %1927 = vmatprep.subr.bf16.mxu0 %v1926_v18  ;;  %v2006_v5 = vpack.c.bf16 %v504_v6, %v503_v3  ;;  %v487_v18 = vld [vmem:[%s3404_s0 + $0x700] sm:$0xff]  ;;  %v496_v6 = vld [vmem:[%s3404_s0 + $0x748] sm:$0xff] }
  0xf9   :  { %1959 = vmatprep.subr.bf16.mxu1 %v1958_v16  ;;  %v1976_v16 = vpack.c.bf16 %v456_v17, %v455_v13  ;;  %v2008_v23 = vpack.c.bf16 %v488_v10, %v487_v18  ;;  %v514_v13 = vld [vmem:[%s3404_s0 + $0x7d8] sm:$0xff]  ;;  %v1992_v17 = vpack.c.bf16 %v464_v61, %v463_v60  ;;  %v465_v10 = vld [vmem:[%s3404_s0 + $0x650] sm:$0xff]  ;;  %v467_v2 = vld [vmem:[%s3404_s0 + $0x660] sm:$0xff] }
  0xfa   :  { %v519_v48 = vld [vmem:[%s3404_s0 + $0x800] sm:$0xff]  ;;  %v569_v60 = vld [vmem:[%s3404_s0 + $0x990] sm:$0xff]  ;;  %v570_v61 = vld [vmem:[%s3404_s0 + $0x998] sm:$0xff] }
  0xfb   :  { %1929 = vmatpush3.bf16.msra.mxu0 %v1928_v19  ;;  %v489_v19 = vld [vmem:[%s3404_s0 + $0x710] sm:$0xff] }
  0xfc   :  { %1961 = vmatpush3.bf16.msra.mxu1 %v1960_v20  ;;  %1931 = vmatprep.subr.bf16.mxu0 %v1930_v58  ;;  %v1978_v20 = vpack.c.bf16 %v474_v4, %v473_v0  ;;  %v490_v58 = vld [vmem:[%s3404_s0 + $0x718] sm:$0xff]  ;;  %v497_v4 = vld [vmem:[%s3404_s0 + $0x750] sm:$0xff] }
  0xfd   :  { %1963 = vmatprep.subr.bf16.mxu1 %v1962_v21  ;;  %v507_v21 = vld [vmem:[%s3404_s0 + $0x7a0] sm:$0xff]  ;;  %v2012_v28 = vpack.c.bf16 %v490_v58, %v489_v19  ;;  %v466_v0 = vld [vmem:[%s3404_s0 + $0x658] sm:$0xff] }
  0xfe   :  { %v1996_v19 = vpack.c.bf16 %v466_v0, %v465_v10  ;;  %v572_v10 = vld [vmem:[%s3404_s0 + $0x9a8] sm:$0xff] }
  0xff   :  { %1933 = vmatpush3.bf16.msra.mxu0 %v1932_v33  ;;  %v491_v33 = vld [vmem:[%s3404_s0 + $0x720] sm:$0xff] }
 0x100   :  { %1965 = vmatpush3.bf16.msra.mxu1 %v1964_v34  ;;  %1935 = vmatprep.subr.bf16.mxu0 %v1934_v36  ;;  %v477_v34 = vld [vmem:[%s3404_s0 + $0x6b0] sm:$0xff]  ;;  %v478_v36 = vld [vmem:[%s3404_s0 + $0x6b8] sm:$0xff] }
 0x101   :  { %1967 = vmatprep.subr.bf16.mxu1 %v1966_v54  ;;  %v1986_v54 = vpack.c.bf16 %v478_v36, %v477_v34  ;;  %v470_v34 = vld [vmem:[%s3404_s0 + $0x678] sm:$0xff]  ;;  %v501_v36 = vld [vmem:[%s3404_s0 + $0x770] sm:$0xff] }
 0x103   :  { %1937 = vmatpush3.bf16.msra.mxu0 %v1936_v49  ;;  %v479_v49 = vld [vmem:[%s3404_s0 + $0x6c0] sm:$0xff] }
 0x104   :  { %1969 = vmatpush3.bf16.msra.mxu1 %v1968_v50  ;;  %1939 = vmatprep.subr.bf16.mxu0 %v1938_v51  ;;  %v480_v50 = vld [vmem:[%s3404_s0 + $0x6c8] sm:$0xff]  ;;  %v511_v51 = vld [vmem:[%s3404_s0 + $0x7c0] sm:$0xff] }
 0x105   :  { %1971 = vmatprep.subr.bf16.mxu1 %v1970_v57  ;;  %v1990_v57 = vpack.c.bf16 %v480_v50, %v479_v49  ;;  %v2022_v3 = vpack.c.bf16 %v512_v52, %v511_v51  ;;  %v520_v49 = vld [vmem:[%s3404_s0 + $0x808] sm:$0xff]  ;;  %v551_v51 = vld [vmem:[%s3404_s0 + $0x900] sm:$0xff] }
 0x106   :  { %v552_v52 = vld [vmem:[%s3404_s0 + $0x908] sm:$0xff] }
 0x107   :  { %1941 = vmatpush3.bf16.msra.mxu0 %v1940_v9  ;;  %v481_v9 = vld [vmem:[%s3404_s0 + $0x6d0] sm:$0xff] }
 0x108   :  { %1973 = vmatpush3.bf16.msra.mxu1 %v1972_v11  ;;  %1975 = vmatprep.subr.bf16.mxu0 %v1974_v12  ;;  %v482_v11 = vld [vmem:[%s3404_s0 + $0x6d8] sm:$0xff]  ;;  %v513_v12 = vld [vmem:[%s3404_s0 + $0x7d0] sm:$0xff] }
 0x109   :  { %2007 = vmatprep.subr.bf16.mxu1 %v2006_v5  ;;  %v2024_v5 = vpack.c.bf16 %v496_v6, %v495_v1  ;;  %v1994_v18 = vpack.c.bf16 %v482_v11, %v481_v9  ;;  %v2072_v1 = vpack.c.bf16 %v552_v52, %v551_v51  ;;  %v522_v6 = vld [vmem:[%s3404_s0 + $0x818] sm:$0xff]  ;;  %v553_v9 = vld [vmem:[%s3404_s0 + $0x910] sm:$0xff] }
 0x10a   :  { %944 = vmatmul.mubr.f32.vlgmr.msra.gmra.mrb[4].mxu0 %v2611_v27  ;;  %v459_v27 = vld [vmem:[%s3404_s0 + $0x620] sm:$0xff]  ;;  %v562_v52 = vld [vmem:[%s3404_s0 + $0x958] sm:$0xff] }
 0x10b   :  { %1014 = vmatmul.mubr.f32.vlgmr.msra.gmra.mrb[4].mxu1 %v2592_v14  ;;  %1977 = vmatpush3.bf16.msra.mxu0 %v1976_v16  ;;  %v2014_v14 = vpack.c.bf16 %v508_v25, %v507_v21  ;;  %v1984_v38 = vpack.c.bf16 %v460_v31, %v459_v27  ;;  %v2026_v16 = vpack.c.bf16 %v514_v13, %v513_v12  ;;  %v500_v25 = vld [vmem:[%s3404_s0 + $0x768] sm:$0xff]  ;;  %v518_v27 = vld [vmem:[%s3404_s0 + $0x7f8] sm:$0xff]  ;;  %v539_v13 = vld [vmem:[%s3404_s0 + $0x8a0] sm:$0xff] }
 0x10c   :  { %1083 = vmatprep.mubr.f32.mxu0 %v2626_v35  ;;  %2009 = vmatpush3.bf16.msra.mxu1 %v2008_v23  ;;  %v492_v35 = vld [vmem:[%s3404_s0 + $0x728] sm:$0xff]  ;;  %v2030_v21 = vpack.c.bf16 %v516_v39, %v515_v32  ;;  %v2000_v31 = vpack.c.bf16 %v468_v62, %v467_v2  ;;  %v554_v12 = vld [vmem:[%s3404_s0 + $0x918] sm:$0xff]  ;;  %v573_v39 = vld [vmem:[%s3404_s0 + $0x9b0] sm:$0xff] }
 0x10d   :  { %1153 = vmatprep.mubr.f32.mxu1 %v2646_v44  ;;  %1979 = vmatprep.subr.bf16.mxu0 %v1978_v20  ;;  %v510_v44 = vld [vmem:[%s3404_s0 + $0x7b8] sm:$0xff]  ;;  %v2016_v40 = vpack.c.bf16 %v492_v35, %v491_v33  ;;  %v484_v23 = vld [vmem:[%s3404_s0 + $0x6e8] sm:$0xff]  ;;  %v2028_v20 = vpack.c.bf16 %v498_v24, %v497_v4  ;;  %v469_v35 = vld [vmem:[%s3404_s0 + $0x670] sm:$0xff]  ;;  %v2076_v4 = vpack.c.bf16 %v554_v12, %v553_v9 }
 0x10e   :  { %2011 = vmatprep.subr.bf16.mxu1 %v2010_v63  ;;  %v2018_v47 = vpack.c.bf16 %v510_v44, %v509_v37  ;;  %v1998_v58 = vpack.c.bf16 %v484_v23, %v483_v22  ;;  %v499_v63 = vld [vmem:[%s3404_s0 + $0x760] sm:$0xff]  ;;  %v502_v44 = vld [vmem:[%s3404_s0 + $0x778] sm:$0xff]  ;;  %v2004_v45 = vpack.c.bf16 %v470_v34, %v469_v35  ;;  %v524_v24 = vld [vmem:[%s3404_s0 + $0x828] sm:$0xff] }
 0x10f   :  { %1981 = vmatpush3.bf16.msra.mxu0 %v1980_v26  ;;  %v485_v26 = vld [vmem:[%s3404_s0 + $0x6f0] sm:$0xff]  ;;  %v2032_v33 = vpack.c.bf16 %v500_v25, %v499_v63  ;;  %v2036_v46 = vpack.c.bf16 %v502_v44, %v501_v36  ;;  %v555_v22 = vld [vmem:[%s3404_s0 + $0x920] sm:$0xff]  ;;  %v542_v32 = vld [vmem:[%s3404_s0 + $0x8b8] sm:$0xff] }
 0x110   :  { %2013 = vmatpush3.bf16.msra.mxu1 %v2012_v28  ;;  %1983 = vmatprep.subr.bf16.mxu0 %v1982_v29  ;;  %v486_v28 = vld [vmem:[%s3404_s0 + $0x6f8] sm:$0xff]  ;;  %v517_v29 = vld [vmem:[%s3404_s0 + $0x7f0] sm:$0xff]  ;;  %v527_v35 = vld [vmem:[%s3404_s0 + $0x840] sm:$0xff] }
 0x111   :  { %2015 = vmatprep.subr.bf16.mxu1 %v2014_v14  ;;  %v2002_v14 = vpack.c.bf16 %v486_v28, %v485_v26  ;;  %v2034_v37 = vpack.c.bf16 %v518_v27, %v517_v29  ;;  %v541_v23 = vld [vmem:[%s3404_s0 + $0x8b0] sm:$0xff]  ;;  %v526_v62 = vld [vmem:[%s3404_s0 + $0x838] sm:$0xff]  ;;  %v543_v26 = vld [vmem:[%s3404_s0 + $0x8c0] sm:$0xff] }
 0x112   :  { %v525_v2 = vld [vmem:[%s3404_s0 + $0x830] sm:$0xff]  ;;  %v558_v25 = vld [vmem:[%s3404_s0 + $0x938] sm:$0xff]  ;;  %v544_v28 = vld [vmem:[%s3404_s0 + $0x8c8] sm:$0xff] }
 0x113   :  { %1985 = vmatpush3.bf16.msra.mxu0 %v1984_v38  ;;  %v535_v38 = vld [vmem:[%s3404_s0 + $0x880] sm:$0xff]  ;;  %v557_v63 = vld [vmem:[%s3404_s0 + $0x930] sm:$0xff]  ;;  %v576_v27 = vld [vmem:[%s3404_s0 + $0x9c8] sm:$0xff] }
 0x114   :  { %2017 = vmatpush3.bf16.msra.mxu1 %v2016_v40  ;;  %1987 = vmatprep.subr.bf16.mxu0 %v1986_v54  ;;  %v536_v40 = vld [vmem:[%s3404_s0 + $0x888] sm:$0xff]  ;;  %v567_v54 = vld [vmem:[%s3404_s0 + $0x980] sm:$0xff] }
 0x115   :  { %2019 = vmatprep.subr.bf16.mxu1 %v2018_v47  ;;  %v2038_v47 = vpack.c.bf16 %v536_v40, %v535_v38  ;;  %v2070_v50 = vpack.c.bf16 %v568_v55, %v567_v54  ;;  %v575_v29 = vld [vmem:[%s3404_s0 + $0x9c0] sm:$0xff]  ;;  %v528_v34 = vld [vmem:[%s3404_s0 + $0x848] sm:$0xff]  ;;  %v545_v38 = vld [vmem:[%s3404_s0 + $0x8d0] sm:$0xff] }
 0x116   :  { %v559_v36 = vld [vmem:[%s3404_s0 + $0x940] sm:$0xff]  ;;  %v560_v44 = vld [vmem:[%s3404_s0 + $0x948] sm:$0xff]  ;;  %v546_v40 = vld [vmem:[%s3404_s0 + $0x8d8] sm:$0xff] }
 0x117   :  { %1989 = vmatpush3.bf16.msra.mxu0 %v1988_v53  ;;  %v537_v53 = vld [vmem:[%s3404_s0 + $0x890] sm:$0xff]  ;;  %v578_v55 = vld [vmem:[%s3404_s0 + $0x9d8] sm:$0xff]  ;;  %v532_v9 = vld [vmem:[%s3404_s0 + $0x868] sm:$0xff] }
 0x118   :  { %2021 = vmatpush3.bf16.msra.mxu1 %v2020_v56  ;;  %1991 = vmatprep.subr.bf16.mxu0 %v1990_v57  ;;  %v538_v56 = vld [vmem:[%s3404_s0 + $0x898] sm:$0xff]  ;;  %v2040_v57 = vpack.c.bf16 %v520_v49, %v519_v48  ;;  %v577_v54 = vld [vmem:[%s3404_s0 + $0x9d0] sm:$0xff] }
 0x119   :  { %2023 = vmatprep.subr.bf16.mxu1 %v2022_v3  ;;  %v521_v3 = vld [vmem:[%s3404_s0 + $0x810] sm:$0xff]  ;;  %v2042_v11 = vpack.c.bf16 %v538_v56, %v537_v53  ;;  %v530_v49 = vld [vmem:[%s3404_s0 + $0x858] sm:$0xff]  ;;  %v2090_v51 = vpack.c.bf16 %v578_v55, %v577_v54  ;;  %v547_v53 = vld [vmem:[%s3404_s0 + $0x8e0] sm:$0xff] }
 0x11a   :  { %v2044_v0 = vpack.c.bf16 %v522_v6, %v521_v3  ;;  %v529_v48 = vld [vmem:[%s3404_s0 + $0x850] sm:$0xff]  ;;  %v548_v56 = vld [vmem:[%s3404_s0 + $0x8e8] sm:$0xff]  ;;  %v531_v6 = vld [vmem:[%s3404_s0 + $0x860] sm:$0xff] }
 0x11b   :  { %1993 = vmatpush3.bf16.msra.mxu0 %v1992_v17  ;;  %v540_v17 = vld [vmem:[%s3404_s0 + $0x8a8] sm:$0xff]  ;;  %v2062_v3 = vpack.c.bf16 %v548_v56, %v547_v53 }
 0x11c   :  { %2025 = vmatpush3.bf16.msra.mxu1 %v2024_v5  ;;  %1995 = vmatprep.subr.bf16.mxu0 %v1994_v18  ;;  %v2074_v5 = vpack.c.bf16 %v570_v61, %v569_v60  ;;  %v571_v18 = vld [vmem:[%s3404_s0 + $0x9a0] sm:$0xff]  ;;  %v580_v60 = vld [vmem:[%s3404_s0 + $0x9e8] sm:$0xff]  ;;  %v2060_v61 = vpack.c.bf16 %v530_v49, %v529_v48 }
 0x11d   :  { %2027 = vmatprep.subr.bf16.mxu1 %v2026_v16  ;;  %v2046_v16 = vpack.c.bf16 %v540_v17, %v539_v13  ;;  %v564_v13 = vld [vmem:[%s3404_s0 + $0x968] sm:$0xff]  ;;  %v549_v17 = vld [vmem:[%s3404_s0 + $0x8f0] sm:$0xff] }
 0x11f   :  { %1997 = vmatpush3.bf16.msra.mxu0 %v1996_v19 }
 0x120   :  { %2029 = vmatpush3.bf16.msra.mxu1 %v2028_v20  ;;  %1999 = vmatprep.subr.bf16.mxu0 %v1998_v58  ;;  %v2050_v58 = vpack.c.bf16 %v542_v32, %v541_v23 }
 0x121   :  { %2031 = vmatprep.subr.bf16.mxu1 %v2030_v21 }
 0x123   :  { %2001 = vmatpush3.bf16.msra.mxu0 %v2000_v31  ;;  %v2052_v31 = vpack.c.bf16 %v526_v62, %v525_v2  ;;  %v586_v2 = vld [vmem:[%s3404_s0 + $0xa18] sm:$0xff] }
 0x124   :  { %2033 = vmatpush3.bf16.msra.mxu1 %v2032_v33  ;;  %2003 = vmatprep.subr.bf16.mxu0 %v2002_v14  ;;  %v2084_v33 = vpack.c.bf16 %v558_v25, %v557_v63  ;;  %v2054_v14 = vpack.c.bf16 %v544_v28, %v543_v26  ;;  %v587_v63 = vld [vmem:[%s3404_s0 + $0xa20] sm:$0xff] }
 0x125   :  { %2035 = vmatprep.subr.bf16.mxu1 %v2034_v37  ;;  %v2086_v37 = vpack.c.bf16 %v576_v27, %v575_v29  ;;  %v591_v28 = vld [vmem:[%s3404_s0 + $0xa40] sm:$0xff]  ;;  %v593_v27 = vld [vmem:[%s3404_s0 + $0xa50] sm:$0xff] }
 0x127   :  { %2005 = vmatpush3.bf16.msra.mxu0 %v2004_v45  ;;  %v2056_v45 = vpack.c.bf16 %v528_v34, %v527_v35  ;;  %v596_v35 = vld [vmem:[%s3404_s0 + $0xa68] sm:$0xff] }
 0x128   :  { %2037 = vmatpush3.bf16.msra.mxu1 %v2036_v46  ;;  %2039 = vmatprep.subr.bf16.mxu0 %v2038_v47  ;;  %v2088_v46 = vpack.c.bf16 %v560_v44, %v559_v36  ;;  %v2058_v47 = vpack.c.bf16 %v546_v40, %v545_v38  ;;  %v597_v36 = vld [vmem:[%s3404_s0 + $0xa70] sm:$0xff] }
 0x129   :  { %2071 = vmatprep.subr.bf16.mxu1 %v2070_v50  ;;  %v561_v50 = vld [vmem:[%s3404_s0 + $0x950] sm:$0xff] }
 0x12a   :  { %1084 = vmatmul.mubr.f32.vlgmr.msra.gmra.mrb[6].mxu0 %v2636_v41  ;;  %v523_v41 = vld [vmem:[%s3404_s0 + $0x820] sm:$0xff] }
 0x12b   :  { %1154 = vmatmul.mubr.f32.vlgmr.msra.gmra.mrb[6].mxu1 %v2640_v42  ;;  %2041 = vmatpush3.bf16.msra.mxu0 %v2040_v57  ;;  %v2078_v42 = vpack.c.bf16 %v572_v10, %v571_v18  ;;  %v2048_v19 = vpack.c.bf16 %v524_v24, %v523_v41  ;;  %v579_v57 = vld [vmem:[%s3404_s0 + $0x9e0] sm:$0xff]  ;;  %v581_v18 = vld [vmem:[%s3404_s0 + $0x9f0] sm:$0xff]  ;;  %v582_v10 = vld [vmem:[%s3404_s0 + $0x9f8] sm:$0xff] }
 0x12c   :  { %1223 = vmatprep.mubr.f32.mxu0 %v2642_v43  ;;  %2073 = vmatpush3.bf16.msra.mxu1 %v2072_v1  ;;  %v556_v43 = vld [vmem:[%s3404_s0 + $0x928] sm:$0xff]  ;;  %v2092_v1 = vpack.c.bf16 %v562_v52, %v561_v50  ;;  %v2094_v12 = vpack.c.bf16 %v580_v60, %v579_v57  ;;  %v533_v41 = vld [vmem:[%s3404_s0 + $0x870] sm:$0xff]  ;;  %v534_v24 = vld [vmem:[%s3404_s0 + $0x878] sm:$0xff] }
 0x12d   :  { %1293 = vmatprep.mubr.f32.mxu1 %v2667_v59  ;;  %2043 = vmatprep.subr.bf16.mxu0 %v2042_v11  ;;  %v574_v59 = vld [vmem:[%s3404_s0 + $0x9b8] sm:$0xff]  ;;  %v2080_v20 = vpack.c.bf16 %v556_v43, %v555_v22  ;;  %v563_v11 = vld [vmem:[%s3404_s0 + $0x960] sm:$0xff]  ;;  %v2098_v22 = vpack.c.bf16 %v582_v10, %v581_v18  ;;  %v2068_v23 = vpack.c.bf16 %v534_v24, %v533_v41 }
 0x12e   :  { %2075 = vmatprep.subr.bf16.mxu1 %v2074_v5  ;;  %v2082_v21 = vpack.c.bf16 %v574_v59, %v573_v39  ;;  %v550_v5 = vld [vmem:[%s3404_s0 + $0x8f8] sm:$0xff]  ;;  %v583_v39 = vld [vmem:[%s3404_s0 + $0xa00] sm:$0xff]  ;;  %v584_v59 = vld [vmem:[%s3404_s0 + $0xa08] sm:$0xff] }
 0x12f   :  { %2045 = vmatpush3.bf16.msra.mxu0 %v2044_v0  ;;  %v2064_v0 = vpack.c.bf16 %v532_v9, %v531_v6  ;;  %v566_v43 = vld [vmem:[%s3404_s0 + $0x978] sm:$0xff] }
 0x130   :  { %2077 = vmatpush3.bf16.msra.mxu1 %v2076_v4  ;;  %2047 = vmatprep.subr.bf16.mxu0 %v2046_v16  ;;  %v2096_v4 = vpack.c.bf16 %v564_v13, %v563_v11  ;;  %v2066_v16 = vpack.c.bf16 %v550_v5, %v549_v17 }
 0x131   :  { %2079 = vmatprep.subr.bf16.mxu1 %v2078_v42  ;;  %v565_v42 = vld [vmem:[%s3404_s0 + $0x970] sm:$0xff] }
 0x132   :  { %v2100_v32 = vpack.c.bf16 %v566_v43, %v565_v42 }
 0x133   :  { %2049 = vmatpush3.bf16.msra.mxu0 %v2048_v19  ;;  %v2103_v19 = vpack.c.bf16 %v584_v59, %v583_v39 }
 0x134   :  { %2081 = vmatpush3.bf16.msra.mxu1 %v2080_v20  ;;  %2051 = vmatprep.subr.bf16.mxu0 %v2050_v58  ;;  %v2163_v20 = vmov 0.0|0.0   ;;  %v585_v58 = vld [vmem:[%s3404_s0 + $0xa10] sm:$0xff] }
 0x135   :  { %2083 = vmatprep.subr.bf16.mxu1 %v2082_v21  ;;  %v2106_v62 = vpack.c.bf16 %v586_v2, %v585_v58  ;;  %v588_v21 = vld [vmem:[%s3404_s0 + $0xa28] sm:$0xff] }
 0x136   :  { %v2109_v25 = vpack.c.bf16 %v588_v21, %v587_v63 }
 0x137   :  { %2053 = vmatpush3.bf16.msra.mxu0 %v2052_v31  ;;  %v594_v31 = vld [vmem:[%s3404_s0 + $0xa58] sm:$0xff] }
 0x138   :  { %2085 = vmatpush3.bf16.msra.mxu1 %v2084_v33  ;;  %2055 = vmatprep.subr.bf16.mxu0 %v2054_v14  ;;  %v2118_v33 = vpack.c.bf16 %v594_v31, %v593_v27  ;;  %v595_v14 = vld [vmem:[%s3404_s0 + $0xa60] sm:$0xff] }
 0x139   :  { %2087 = vmatprep.subr.bf16.mxu1 %v2086_v37  ;;  %v2121_v34 = vpack.c.bf16 %v596_v35, %v595_v14  ;;  %v598_v37 = vld [vmem:[%s3404_s0 + $0xa78] sm:$0xff] }
 0x13a   :  { %v2124_v44 = vpack.c.bf16 %v598_v37, %v597_v36 }
 0x13b   :  { %2057 = vmatpush3.bf16.msra.mxu0 %v2056_v45 }
 0x13c   :  { %2089 = vmatpush3.bf16.msra.mxu1 %v2088_v46  ;;  %2059 = vmatprep.subr.bf16.mxu0 %v2058_v47 }
 0x13d   :  { %2091 = vmatprep.subr.bf16.mxu1 %v2090_v51 }
 0x13f   :  { %2061 = vmatpush3.bf16.msra.mxu0 %v2060_v61 }
 0x140   :  { %2093 = vmatpush3.bf16.msra.mxu1 %v2092_v1  ;;  %2063 = vmatprep.subr.bf16.mxu0 %v2062_v3 }
 0x141   :  { %2095 = vmatprep.subr.bf16.mxu1 %v2094_v12 }
 0x143   :  { %2065 = vmatpush3.bf16.msra.mxu0 %v2064_v0 }
 0x144   :  { %2097 = vmatpush3.bf16.msra.mxu1 %v2096_v4  ;;  %2067 = vmatprep.subr.bf16.mxu0 %v2066_v16 }
 0x145   :  { %2099 = vmatprep.subr.bf16.mxu1 %v2098_v22 }
 0x147   :  { %2069 = vmatpush3.bf16.msra.mxu0 %v2068_v23 }
 0x148   :  { %2101 = vmatpush3.bf16.msra.mxu1 %v2100_v32  ;;  %2102 = vmatprep.subr.bf16.mxu0 %v2163_v20 }
 0x14a   :  { %1224 = vmatmul.mubr.f32.vlgmr.msra.gmra.mrb[8].mxu0 %v2692_v15  ;;  %v590_v15 = vld [vmem:[%s3404_s0 + $0xa38] sm:$0xff] }
 0x14b   :  { %1294 = vmatmul.mubr.f32.vlgmr.msra.gmra.mrb[8].mxu1 %v2680_v7  ;;  %2104 = vmatpush3.bf16.msra.mxu0 %v2103_v19  ;;  %v589_v7 = vld [vmem:[%s3404_s0 + $0xa30] sm:$0xff] }
 0x14c   :  { %2105 = vmatprep.subr.bf16.mxu0 %v2163_v20  ;;  %1779 = vmatprep.mubr.msk.f32.mxu0 %vm2164_vm4, %v2162_v30  ;;  %v2112_v26 = vpack.c.bf16 %v590_v15, %v589_v7  ;;  %v592_v30 = vld [vmem:[%s3404_s0 + $0xa48] sm:$0xff] }
 0x14d   :  { %v2115_v29 = vpack.c.bf16 %v592_v30, %v591_v28 }
 0x14f   :  { %2107 = vmatpush3.bf16.msra.mxu0 %v2106_v62 }
 0x150   :  { %2108 = vmatprep.subr.bf16.mxu0 %v2163_v20 }
 0x153   :  { %2110 = vmatpush3.bf16.msra.mxu0 %v2109_v25 }
 0x154   :  { %2111 = vmatprep.subr.bf16.mxu0 %v2163_v20 }
 0x157   :  { %2113 = vmatpush3.bf16.msra.mxu0 %v2112_v26 }
 0x158   :  { %2114 = vmatprep.subr.bf16.mxu0 %v2163_v20 }
 0x15b   :  { %2116 = vmatpush3.bf16.msra.mxu0 %v2115_v29 }
 0x15c   :  { %2117 = vmatprep.subr.bf16.mxu0 %v2163_v20 }
 0x15f   :  { %2119 = vmatpush3.bf16.msra.mxu0 %v2118_v33 }
 0x160   :  { %2120 = vmatprep.subr.bf16.mxu0 %v2163_v20 }
 0x163   :  { %2122 = vmatpush3.bf16.msra.mxu0 %v2121_v34 }
 0x164   :  { %2123 = vmatprep.subr.bf16.mxu0 %v2163_v20 }
 0x167   :  { %2125 = vmatpush3.bf16.msra.mxu0 %v2124_v44 }
 0x16a   :  { %1780 = vmatmul.mubr.f32.vlgmr.msra.gmra.mrb[10].mxu0 %v2684_v8 }
 0x19d   :  { %v1412_v38 = vpop.f32.mrb[0].mxu0  ;;  %v1447_v40 = vpop.f32.mrb[0].mxu1 }
 0x19e   :  { %v1413_v54 = vpop.f32.mrb[1].mxu0  ;;  %v1448_v55 = vpop.f32.mrb[1].mxu1 }
 0x19f   :  { %v1414_v45 = vadd.f32 %v1413_v54, %v1412_v38  ;;  %v1449_v46 = vadd.f32 %v1448_v55, %v1447_v40 }
 0x1a1   :  { %v736_v47 = vadd.f32 %v1449_v46, %v1414_v45 }
 0x1bd   :  { %v1482_v48 = vpop.f32.mrb[2].mxu0  ;;  %v1517_v49 = vpop.f32.mrb[2].mxu1 }
 0x1be   :  { %v1483_v50 = vpop.f32.mrb[3].mxu0  ;;  %v1518_v51 = vpop.f32.mrb[3].mxu1 }
 0x1bf   :  { %v1484_v52 = vadd.f32 %v1483_v50, %v1482_v48  ;;  %v1519_v53 = vadd.f32 %v1518_v51, %v1517_v49 }
 0x1c1   :  { %v806_v56 = vadd.f32 %v1484_v52, %v736_v47 }
 0x1c3   :  { %v876_v57 = vadd.f32 %v1519_v53, %v806_v56 }
 0x1dd   :  { %v1552_v60 = vpop.f32.mrb[4].mxu0 }
 0x1de   :  { %v1587_v61 = vpop.f32.mrb[4].mxu1  ;;  %v1553_v1 = vpop.f32.mrb[5].mxu0 }
 0x1df   :  { %v1554_v3 = vadd.f32 %v1553_v1, %v1552_v60  ;;  %v1588_v8 = vpop.f32.mrb[5].mxu1 }
 0x1e0   :  { %v1589_v6 = vadd.f32 %v1588_v8, %v1587_v61 }
 0x1e1   :  { %v946_v9 = vadd.f32 %v1554_v3, %v876_v57 }
 0x1e3   :  { %v1016_v11 = vadd.f32 %v1589_v6, %v946_v9 }
 0x1fd   :  { %v1622_v12 = vpop.f32.mrb[6].mxu0 }
 0x1fe   :  { %v1657_v13 = vpop.f32.mrb[6].mxu1  ;;  %v1623_v17 = vpop.f32.mrb[7].mxu0 }
 0x1ff   :  { %v1624_v5 = vadd.f32 %v1623_v17, %v1622_v12  ;;  %v1658_v18 = vpop.f32.mrb[7].mxu1 }
 0x200   :  { %v1659_v10 = vadd.f32 %v1658_v18, %v1657_v13 }
 0x201   :  { %v1086_v0 = vadd.f32 %v1624_v5, %v1016_v11 }
 0x203   :  { %v1156_v4 = vadd.f32 %v1659_v10, %v1086_v0 }
 0x21d   :  { %v1692_v16 = vpop.f32.mrb[8].mxu0 }
 0x21e   :  { %v1727_v41 = vpop.f32.mrb[8].mxu1  ;;  %v1693_v24 = vpop.f32.mrb[9].mxu0 }
 0x21f   :  { %v1694_v22 = vadd.f32 %v1693_v24, %v1692_v16  ;;  %v1728_v42 = vpop.f32.mrb[9].mxu1 }
 0x220   :  { %v1729_v43 = vadd.f32 %v1728_v42, %v1727_v41 }
 0x221   :  { %v1226_v23 = vadd.f32 %v1694_v22, %v1156_v4 }
 0x223   :  { %v1296_v32 = vadd.f32 %v1729_v43, %v1226_v23 }
 0x23d   :  { %v1365_v39 = vpop.f32.mrb[10].mxu0 }
 0x23e   :  { %v1366_v59 = vadd.f32 %v1365_v39, %v1296_v32  ;;  %v1781_v19 = vpop.f32.mrb[11].mxu0 }
 0x240   :  { %1369 = vst [vmem:[%s3409_s5] sm:$0xff] %v1366_v59 }

</bundles_post_ra>
